<compile_context>
chip_gen: v6e
topology: v6e:2x2x1
jax: 0.10.0
libtpu: 0.0.40
codegen_flags: <defaults>
</compile_context>

<pallas_src>
import functools

import jax
import jax.numpy as jnp
from jax.experimental import pallas as pl
from jax.experimental.pallas import tpu as pltpu


def _attn_dense_kernel(q_ref, k_ref, v_ref, wd_ref, bd_ref, o_ref, acc_ref, *,
                       heads_per_step, hd_pad, s_valid, s_pad, compute_dtype,
                       approx_recip):
    hp = pl.program_id(2)

    @pl.when(hp == 0)
    def _():
        acc_ref[...] = jnp.zeros_like(acc_ref)

    head_outs = []
    for j in range(heads_per_step):          # static unroll (2 heads per step)
        head = hp * heads_per_step + j       # dynamic index on a leading axis
        qh = q_ref[0, j]                     # (TQ, hd_pad)   scale already folded in
        kh = k_ref[0, head]                  # (S_pad, hd_pad)
        vh = v_ref[0, head]                  # (S_pad, hd_pad)

        # scores: contract head dim directly (no k transpose), f32 accumulation.
        scores = jax.lax.dot_general(
            qh, kh, (((1,), (1,)), ((), ())),
            preferred_element_type=jnp.float32)               # (TQ, S_pad)

        if s_pad > s_valid:                                   # mask padded keys (static branch)
            col = jax.lax.broadcasted_iota(jnp.int32, scores.shape, 1)
            scores = jnp.where(col < s_valid, scores, -1e30)

        # numerically-stable softmax, stats in f32; normalization deferred to (TQ, hd_pad).
        m = jnp.max(scores, axis=-1, keepdims=True)
        p = jnp.exp(scores - m)
        denom = jnp.sum(p, axis=-1, keepdims=True)
        ho = jnp.dot(p.astype(compute_dtype), vh,
                     preferred_element_type=jnp.float32)      # (TQ, hd_pad)
        ho = ho * pl.reciprocal(denom, approx=approx_recip)
        head_outs.append(ho.astype(compute_dtype))

    if heads_per_step > 1:
        ho_blk = jnp.concatenate(head_outs, axis=-1)          # (TQ, hb*hd_pad), 128-aligned
    else:
        ho_blk = head_outs[0]

    # This head pair's contribution to the output projection (K = hb*hd_pad = 256).
    kwid = heads_per_step * hd_pad
    row0 = pl.multiple_of(hp * kwid, kwid)
    w_rows = wd_ref[pl.ds(row0, kwid), :]                     # (hb*hd_pad, H), resident wd
    acc_ref[...] += jnp.dot(ho_blk, w_rows,
                            preferred_element_type=jnp.float32)

    @pl.when(hp == pl.num_programs(2) - 1)
    def _():
        o_ref[0] = (acc_ref[...] + bd_ref[...]).astype(o_ref.dtype)


def _round_up(x, m):
    return (x + m - 1) // m * m


def _vmem_capacity_bytes():
    try:
        info = pltpu.get_tpu_info()
        cap = getattr(info, "vmem_capacity_bytes", None)
        if cap:
            return int(cap)
    except Exception:
        pass
    return 64 << 20   # conservative (v7x-sized) fallback


def eva2clip_attention(x, w_qkv, b_qkv, w_dense, b_dense, *, num_heads,
                       compute_dtype=jnp.bfloat16, tq=None):
    B, S, H = x.shape
    assert H % num_heads == 0, "hidden_size must divide num_heads"
    nh = num_heads
    hd = H // nh
    hd_pad = _round_up(hd, 128)
    H_pad = nh * hd_pad
    scale = hd ** (-0.5)
    cdt = jnp.dtype(compute_dtype)
    f32 = jnp.float32
    approx_recip = cdt != jnp.dtype(jnp.float32)   # exact reciprocal on f32 parity path

    S_pad = _round_up(S, 128)
    hb = 2 if nh % 2 == 0 else 1                   # heads per grid step

    # ---- host-side weight re-layout (per-head columns, hd zero-padded to 128) ----
    b_flat = b_qkv.reshape(-1).astype(f32)

    def _w_cols(col0, s=1.0):                      # (H, H) slice -> (H, nh*hd_pad)
        w = w_qkv[:, col0:col0 + H].reshape(H, nh, hd).astype(f32) * s
        w = jnp.pad(w, ((0, 0), (0, 0), (0, hd_pad - hd)))
        return w.reshape(H, nh * hd_pad).astype(cdt)

    def _b_cols(col0, s=1.0):                      # (H,) slice -> (nh*hd_pad,) f32
        b = b_flat[col0:col0 + H].reshape(nh, hd) * s
        b = jnp.pad(b, ((0, 0), (0, hd_pad - hd)))
        return b.reshape(nh * hd_pad)

    wq_p = _w_cols(0, scale)                       # scale folded into W_q / b_q
    wk_p = _w_cols(H)
    wv_p = _w_cols(2 * H)
    bq_p = _b_cols(0, scale)
    bk_p = _b_cols(H)
    bv_p = _b_cols(2 * H)

    wd_p = w_dense.reshape(nh, hd, H).astype(f32)
    wd_p = jnp.pad(wd_p, ((0, 0), (0, hd_pad - hd), (0, 0)))
    wd_p = wd_p.reshape(H_pad, H).astype(cdt)      # padded rows are zero -> exact
    bd_p = b_dense.reshape(1, H).astype(f32)

    # ---- hoisted QKV projection: one XLA GEMM, done once (review option (b)) ----
    x_p = jnp.pad(x, ((0, 0), (0, S_pad - S), (0, 0))).astype(cdt)

    def _project(w, b):
        y = jnp.dot(x_p, w, preferred_element_type=f32) + b          # (B, S_pad, H_pad)
        y = y.reshape(B, S_pad, nh, hd_pad).transpose(0, 2, 1, 3)    # (B, nh, S_pad, hd_pad)
        return y.astype(cdt)

    q = _project(wq_p, bq_p)
    k = _project(wk_p, bk_p)
    v = _project(wv_p, bv_p)

    # ---- tile-size / VMEM budget (double-buffered blocks + f32 accumulator) ----
    cdt_b = cdt.itemsize
    out_b = jnp.dtype(x.dtype).itemsize

    def _vmem_needed(tq_):
        blocks = (hb * tq_ * hd_pad * cdt_b             # Q tile (head pair)
                  + 2 * nh * S_pad * hd_pad * cdt_b     # K + V (all heads, per batch)
                  + H_pad * H * cdt_b                   # W_dense (resident full block)
                  + H * 4                               # dense bias
                  + tq_ * H * out_b)                    # output tile
        return 2 * blocks + tq_ * H * 4                 # x2 pipeline buffers + accumulator

    vmem_cap = _vmem_capacity_bytes()
    if tq is None:
        tq = 128
        for cand in (512, 256, 128):
            if S_pad % cand == 0 and _vmem_needed(cand) <= int(vmem_cap * 0.6):
                tq = cand
                break
    assert S_pad % tq == 0 and tq % 8 == 0 and tq <= S_pad
    n_qt = S_pad // tq

    vmem_limit = int(min(_vmem_needed(tq) + (8 << 20), vmem_cap - (8 << 20)))
    vmem_limit = max(vmem_limit, _vmem_needed(tq) + (1 << 20))

    kernel = functools.partial(
        _attn_dense_kernel, heads_per_step=hb, hd_pad=hd_pad, s_valid=S,
        s_pad=S_pad, compute_dtype=cdt, approx_recip=approx_recip)

    grid = (B, n_qt, nh // hb)
    in_specs = [
        pl.BlockSpec((1, hb, tq, hd_pad), lambda b, qt, hp: (b, hp, qt, 0)),    # Q tile
        pl.BlockSpec((1, nh, S_pad, hd_pad), lambda b, qt, hp: (b, 0, 0, 0)),   # K (all heads)
        pl.BlockSpec((1, nh, S_pad, hd_pad), lambda b, qt, hp: (b, 0, 0, 0)),   # V (all heads)
        pl.BlockSpec((H_pad, H), lambda b, qt, hp: (0, 0)),                     # W_dense (resident)
        pl.BlockSpec((1, H), lambda b, qt, hp: (0, 0)),                         # dense bias
    ]
    out_specs = pl.BlockSpec((1, tq, H), lambda b, qt, hp: (b, qt, 0))

    out = pl.pallas_call(
        kernel,
        out_shape=jax.ShapeDtypeStruct((B, S_pad, H), x.dtype),
        grid_spec=pltpu.PrefetchScalarGridSpec(
            num_scalar_prefetch=0,
            grid=grid,
            in_specs=in_specs,
            out_specs=out_specs,
            scratch_shapes=[pltpu.VMEM((tq, H), jnp.float32)]),
        compiler_params=pltpu.CompilerParams(
            dimension_semantics=("parallel", "parallel", "arbitrary"),
            vmem_limit_bytes=vmem_limit),
    )(q, k, v, wd_p, bd_p)

    return out[:, :S, :]


def reference_attention(x, w_qkv, b_qkv, w_dense, b_dense, *, num_heads):
    """Plain-JAX f32 reference matching the PyTorch forward semantics."""
    B, S, H = x.shape
    hd = H // num_heads
    scale = hd ** (-0.5)
    qkv = x @ w_qkv + b_qkv.reshape(-1)                      # (B, S, 3H)
    q, k, v = jnp.split(qkv, 3, axis=-1)
    q = q.reshape(B, S, num_heads, hd).transpose(0, 2, 1, 3)
    k = k.reshape(B, S, num_heads, hd).transpose(0, 2, 1, 3)
    v = v.reshape(B, S, num_heads, hd).transpose(0, 2, 1, 3)
    scores = jnp.einsum('bhqd,bhkd->bhqk', q, k) * scale
    attn = jax.nn.softmax(scores, axis=-1)
    out = jnp.einsum('bhqk,bhkd->bhqd', attn, v)
    out = out.transpose(0, 2, 1, 3).reshape(B, S, H)         # transpose(1,2) + flatten(-2,-1)
    return out @ w_dense + b_dense.reshape(-1)


if __name__ == "__main__":
    B, S, H = 2, 8, 32
    num_heads = 4

    key = jax.random.PRNGKey(0)
    kx, kw1, kb1, kw2, kb2 = jax.random.split(key, 5)

    x = jax.random.normal(kx, (B, S, H), dtype=jnp.float32)
    w_qkv = jax.random.normal(kw1, (H, 3 * H), dtype=jnp.float32) * 0.05
    b_qkv = jax.random.normal(kb1, (1, 3 * H), dtype=jnp.float32) * 0.05
    w_dense = jax.random.normal(kw2, (H, H), dtype=jnp.float32) * 0.05
    b_dense = jax.random.normal(kb2, (1, H), dtype=jnp.float32) * 0.05

    ref = reference_attention(x, w_qkv, b_qkv, w_dense, b_dense, num_heads=num_heads)

    # f32 MXU path (exact reciprocal; exercises the padded-seq key-mask path too).
    out_f32 = eva2clip_attention(x, w_qkv, b_qkv, w_dense, b_dense,
                                 num_heads=num_heads, compute_dtype=jnp.float32)
    out_f32 = jax.block_until_ready(out_f32)
    assert out_f32.shape == (B, S, H)
    assert jnp.allclose(out_f32, ref, atol=5e-3, rtol=5e-3), "f32 path mismatch vs reference"

    # bf16 MXU path (production default: bf16 operands, f32 accumulation).
    out_bf16 = eva2clip_attention(x, w_qkv, b_qkv, w_dense, b_dense,
                                  num_heads=num_heads, compute_dtype=jnp.bfloat16)
    out_bf16 = jax.block_until_ready(out_bf16)
    assert out_bf16.shape == (B, S, H)
    assert jnp.allclose(out_bf16, ref, atol=3e-2, rtol=3e-2), "bf16 path mismatch vs reference"

    print("KERNEL_OK")
</pallas_src>

<mosaic_0001>
module attributes {stable_mosaic.version = 11 : i64} {
  func.func @_attn_dense_kernel(%arg0: i32, %arg1: i32, %arg2: i32, %arg3: memref<1x2x128x128xf32, #tpu.memory_space<vmem>>, %arg4: memref<1x4x128x128xf32, #tpu.memory_space<vmem>>, %arg5: memref<1x4x128x128xf32, #tpu.memory_space<vmem>>, %arg6: memref<512x32xf32, #tpu.memory_space<vmem>>, %arg7: memref<1x32xf32, #tpu.memory_space<vmem>>, %arg8: memref<1x128x32xf32, #tpu.memory_space<vmem>>, %arg9: memref<128x32xf32, #tpu.memory_space<vmem>>) attributes {dimension_semantics = [#tpu.dimension_semantics<parallel>, #tpu.dimension_semantics<parallel>, #tpu.dimension_semantics<arbitrary>], iteration_bounds = array<i64: 2, 1, 2>, scalar_prefetch = 0 : i64, scratch_operands = 1 : i64, tpu.core_type = #tpu.core_type<tc>, window_params = [{transform_indices = @transform_0, window_bounds = array<i64: 1, 2, 128, 128>}, {transform_indices = @transform_1, window_bounds = array<i64: 1, 4, 128, 128>}, {transform_indices = @transform_2, window_bounds = array<i64: 1, 4, 128, 128>}, {pipeline_mode = #tpu.pipeline_mode<synchronous>, transform_indices = @transform_3, window_bounds = array<i64: 512, 32>}, {pipeline_mode = #tpu.pipeline_mode<synchronous>, transform_indices = @transform_4, window_bounds = array<i64: 1, 32>}, {transform_indices = @transform_5, window_bounds = array<i64: 1, 128, 32>}]} {
    %c0_i32 = arith.constant 0 : i32
    %0 = arith.cmpi eq, %arg2, %c0_i32 : i32
    %1 = arith.extui %0 : i1 to i32
    %c0_i32_0 = arith.constant 0 : i32
    %2 = arith.cmpi ne, %1, %c0_i32_0 : i32
    scf.if %2 {
      %cst_39 = arith.constant 0.000000e+00 : f32
      %69 = vector.broadcast %cst_39 : f32 to vector<128x32xf32>
      %c0_40 = arith.constant 0 : index
      %c0_41 = arith.constant 0 : index
      %70 = vector.load %arg9[%c0_40, %c0_41] : memref<128x32xf32, #tpu.memory_space<vmem>>, vector<128x32xf32>
      tpu.vector_store %arg9[%c0_40, %c0_41], %69 {strides = array<i32>} : memref<128x32xf32, #tpu.memory_space<vmem>>, vector<128x32xf32>,
    } else {
    }
    %c2_i32 = arith.constant 2 : i32
    %3 = arith.muli %arg2, %c2_i32 : i32
    %c0_i32_1 = arith.constant 0 : i32
    %4 = arith.addi %3, %c0_i32_1 : i32
    %c0 = arith.constant 0 : index
    %c0_2 = arith.constant 0 : index
    %c0_3 = arith.constant 0 : index
    %c0_4 = arith.constant 0 : index
    %5 = vector.load %arg3[%c0, %c0_2, %c0_3, %c0_4] : memref<1x2x128x128xf32, #tpu.memory_space<vmem>>, vector<1x1x128x128xf32>
    %6 = vector.shape_cast %5 : vector<1x1x128x128xf32> to vector<128x128xf32>
    %c0_5 = arith.constant 0 : index
    %7 = arith.index_cast %4 : i32 to index
    %c0_6 = arith.constant 0 : index
    %c0_7 = arith.constant 0 : index
    %8 = vector.load %arg4[%c0_5, %7, %c0_6, %c0_7] : memref<1x4x128x128xf32, #tpu.memory_space<vmem>>, vector<1x1x128x128xf32>
    %9 = vector.shape_cast %8 : vector<1x1x128x128xf32> to vector<128x128xf32>
    %c0_8 = arith.constant 0 : index
    %10 = arith.index_cast %4 : i32 to index
    %c0_9 = arith.constant 0 : index
    %c0_10 = arith.constant 0 : index
    %11 = vector.load %arg5[%c0_8, %10, %c0_9, %c0_10] : memref<1x4x128x128xf32, #tpu.memory_space<vmem>>, vector<1x1x128x128xf32>
    %12 = vector.shape_cast %11 : vector<1x1x128x128xf32> to vector<128x128xf32>
    %cst = arith.constant dense<0.000000e+00> : vector<128x128xf32>
    %13 = tpu.matmul %6, %9, %cst {dimension_numbers = #tpu.dot_dimension_numbers<[1], [1], [0], [0], [0, 0, 1, 0], [], []>} : vector<128x128xf32>, vector<128x128xf32>, vector<128x128xf32> -> vector<128x128xf32>
    %14 = tpu.iota {dimensions = array<i32: 1>} : vector<128x128xi32>
    %c8_i32 = arith.constant 8 : i32
    %15 = vector.broadcast %c8_i32 : i32 to vector<128x128xi32>
    %16 = arith.cmpi slt, %14, %15 : vector<128x128xi32>
    %cst_11 = arith.constant -1.000000e+30 : f32
    %17 = vector.broadcast %cst_11 : f32 to vector<128x128xf32>
    %18 = arith.select %16, %13, %17 : vector<128x128xi1>, vector<128x128xf32>
    %cst_12 = arith.constant dense<0xFF800000> : vector<128xf32>
    %19 = vector.multi_reduction <maximumf>, %18, %cst_12 [1] : vector<128x128xf32> to vector<128xf32>
    %20 = vector.shape_cast %19 : vector<128xf32> to vector<128x1xf32>
    %21 = vector.broadcast %20 : vector<128x1xf32> to vector<128x128xf32>
    %22 = arith.subf %18, %21 : vector<128x128xf32>
    %23 = math.exp %22 : vector<128x128xf32>
    %cst_13 = arith.constant dense<0.000000e+00> : vector<128xf32>
    %24 = vector.multi_reduction <add>, %23, %cst_13 [1] : vector<128x128xf32> to vector<128xf32>
    %25 = vector.shape_cast %24 : vector<128xf32> to vector<128x1xf32>
    %cst_14 = arith.constant dense<0.000000e+00> : vector<128x128xf32>
    %26 = tpu.matmul %23, %12, %cst_14 {dimension_numbers = #tpu.dot_dimension_numbers<[1], [0], [0], [1], [0, 0, 1, 1], [], []>} : vector<128x128xf32>, vector<128x128xf32>, vector<128x128xf32> -> vector<128x128xf32>
    %27 = tpu.reciprocal %25 : vector<128x1xf32> -> vector<128x1xf32>
    %28 = vector.broadcast %27 : vector<128x1xf32> to vector<128x128xf32>
    %29 = arith.mulf %26, %28 : vector<128x128xf32>
    %c2_i32_15 = arith.constant 2 : i32
    %30 = arith.muli %arg2, %c2_i32_15 : i32
    %c1_i32 = arith.constant 1 : i32
    %31 = arith.addi %30, %c1_i32 : i32
    %c0_16 = arith.constant 0 : index
    %c1 = arith.constant 1 : index
    %c0_17 = arith.constant 0 : index
    %c0_18 = arith.constant 0 : index
    %32 = vector.load %arg3[%c0_16, %c1, %c0_17, %c0_18] : memref<1x2x128x128xf32, #tpu.memory_space<vmem>>, vector<1x1x128x128xf32>
    %33 = vector.shape_cast %32 : vector<1x1x128x128xf32> to vector<128x128xf32>
    %c0_19 = arith.constant 0 : index
    %34 = arith.index_cast %31 : i32 to index
    %c0_20 = arith.constant 0 : index
    %c0_21 = arith.constant 0 : index
    %35 = vector.load %arg4[%c0_19, %34, %c0_20, %c0_21] : memref<1x4x128x128xf32, #tpu.memory_space<vmem>>, vector<1x1x128x128xf32>
    %36 = vector.shape_cast %35 : vector<1x1x128x128xf32> to vector<128x128xf32>
    %c0_22 = arith.constant 0 : index
    %37 = arith.index_cast %31 : i32 to index
    %c0_23 = arith.constant 0 : index
    %c0_24 = arith.constant 0 : index
    %38 = vector.load %arg5[%c0_22, %37, %c0_23, %c0_24] : memref<1x4x128x128xf32, #tpu.memory_space<vmem>>, vector<1x1x128x128xf32>
    %39 = vector.shape_cast %38 : vector<1x1x128x128xf32> to vector<128x128xf32>
    %cst_25 = arith.constant dense<0.000000e+00> : vector<128x128xf32>
    %40 = tpu.matmul %33, %36, %cst_25 {dimension_numbers = #tpu.dot_dimension_numbers<[1], [1], [0], [0], [0, 0, 1, 0], [], []>} : vector<128x128xf32>, vector<128x128xf32>, vector<128x128xf32> -> vector<128x128xf32>
    %41 = tpu.iota {dimensions = array<i32: 1>} : vector<128x128xi32>
    %c8_i32_26 = arith.constant 8 : i32
    %42 = vector.broadcast %c8_i32_26 : i32 to vector<128x128xi32>
    %43 = arith.cmpi slt, %41, %42 : vector<128x128xi32>
    %cst_27 = arith.constant -1.000000e+30 : f32
    %44 = vector.broadcast %cst_27 : f32 to vector<128x128xf32>
    %45 = arith.select %43, %40, %44 : vector<128x128xi1>, vector<128x128xf32>
    %cst_28 = arith.constant dense<0xFF800000> : vector<128xf32>
    %46 = vector.multi_reduction <maximumf>, %45, %cst_28 [1] : vector<128x128xf32> to vector<128xf32>
    %47 = vector.shape_cast %46 : vector<128xf32> to vector<128x1xf32>
    %48 = vector.broadcast %47 : vector<128x1xf32> to vector<128x128xf32>
    %49 = arith.subf %45, %48 : vector<128x128xf32>
    %50 = math.exp %49 : vector<128x128xf32>
    %cst_29 = arith.constant dense<0.000000e+00> : vector<128xf32>
    %51 = vector.multi_reduction <add>, %50, %cst_29 [1] : vector<128x128xf32> to vector<128xf32>
    %52 = vector.shape_cast %51 : vector<128xf32> to vector<128x1xf32>
    %cst_30 = arith.constant dense<0.000000e+00> : vector<128x128xf32>
    %53 = tpu.matmul %50, %39, %cst_30 {dimension_numbers = #tpu.dot_dimension_numbers<[1], [0], [0], [1], [0, 0, 1, 1], [], []>} : vector<128x128xf32>, vector<128x128xf32>, vector<128x128xf32> -> vector<128x128xf32>
    %54 = tpu.reciprocal %52 : vector<128x1xf32> -> vector<128x1xf32>
    %55 = vector.broadcast %54 : vector<128x1xf32> to vector<128x128xf32>
    %56 = arith.mulf %53, %55 : vector<128x128xf32>
    %57 = tpu.concatenate %29, %56 in 1 : vector<128x128xf32>, vector<128x128xf32> -> vector<128x256xf32>
    %c256_i32 = arith.constant 256 : i32
    %58 = arith.muli %arg2, %c256_i32 : i32
    %59 = tpu.assume_multiple %58, 256 : i32
    %60 = arith.index_cast %59 : i32 to index
    %c0_31 = arith.constant 0 : index
    %61 = vector.load %arg6[%60, %c0_31] : memref<512x32xf32, #tpu.memory_space<vmem>>, vector<256x32xf32>
    %c0_32 = arith.constant 0 : index
    %c0_33 = arith.constant 0 : index
    %62 = vector.load %arg9[%c0_32, %c0_33] : memref<128x32xf32, #tpu.memory_space<vmem>>, vector<128x32xf32>
    %cst_34 = arith.constant dense<0.000000e+00> : vector<128x32xf32>
    %63 = tpu.matmul %57, %61, %cst_34 {dimension_numbers = #tpu.dot_dimension_numbers<[1], [0], [0], [1], [0, 0, 1, 1], [], []>} : vector<128x256xf32>, vector<256x32xf32>, vector<128x32xf32> -> vector<128x32xf32>
    %64 = arith.addf %62, %63 : vector<128x32xf32>
    %c0_35 = arith.constant 0 : index
    %c0_36 = arith.constant 0 : index
    %65 = vector.load %arg9[%c0_35, %c0_36] : memref<128x32xf32, #tpu.memory_space<vmem>>, vector<128x32xf32>
    tpu.vector_store %arg9[%c0_35, %c0_36], %64 {strides = array<i32>} : memref<128x32xf32, #tpu.memory_space<vmem>>, vector<128x32xf32>,
    %c1_i32_37 = arith.constant 1 : i32
    %66 = arith.cmpi eq, %arg2, %c1_i32_37 : i32
    %67 = arith.extui %66 : i1 to i32
    %c0_i32_38 = arith.constant 0 : i32
    %68 = arith.cmpi ne, %67, %c0_i32_38 : i32
    scf.if %68 {
      %c0_39 = arith.constant 0 : index
      %c0_40 = arith.constant 0 : index
      %69 = vector.load %arg9[%c0_39, %c0_40] : memref<128x32xf32, #tpu.memory_space<vmem>>, vector<128x32xf32>
      %c0_41 = arith.constant 0 : index
      %c0_42 = arith.constant 0 : index
      %70 = vector.load %arg7[%c0_41, %c0_42] : memref<1x32xf32, #tpu.memory_space<vmem>>, vector<1x32xf32>
      %71 = vector.broadcast %70 : vector<1x32xf32> to vector<128x32xf32>
      %72 = arith.addf %69, %71 : vector<128x32xf32>
      %c0_43 = arith.constant 0 : index
      %c0_44 = arith.constant 0 : index
      %c0_45 = arith.constant 0 : index
      %73 = vector.load %arg8[%c0_43, %c0_44, %c0_45] : memref<1x128x32xf32, #tpu.memory_space<vmem>>, vector<1x128x32xf32>
      %74 = vector.shape_cast %73 : vector<1x128x32xf32> to vector<128x32xf32>
      %75 = vector.shape_cast %72 : vector<128x32xf32> to vector<1x128x32xf32>
      tpu.vector_store %arg8[%c0_43, %c0_44, %c0_45], %75 {strides = array<i32>} : memref<1x128x32xf32, #tpu.memory_space<vmem>>, vector<1x128x32xf32>,
    } else {
    }
    return
  }
  func.func @transform_0(%arg0: i32, %arg1: i32, %arg2: i32) -> (i32, i32, i32, i32) {
    %c0_i32 = arith.constant 0 : i32
    %c0_i32_0 = arith.constant 0 : i32
    return %arg0, %arg2, %arg1, %c0_i32 : i32, i32, i32, i32
  }
  func.func @transform_1(%arg0: i32, %arg1: i32, %arg2: i32) -> (i32, i32, i32, i32) {
    %c0_i32 = arith.constant 0 : i32
    %c0_i32_0 = arith.constant 0 : i32
    %c0_i32_1 = arith.constant 0 : i32
    %c0_i32_2 = arith.constant 0 : i32
    return %arg0, %c0_i32, %c0_i32_0, %c0_i32_1 : i32, i32, i32, i32
  }
  func.func @transform_2(%arg0: i32, %arg1: i32, %arg2: i32) -> (i32, i32, i32, i32) {
    %c0_i32 = arith.constant 0 : i32
    %c0_i32_0 = arith.constant 0 : i32
    %c0_i32_1 = arith.constant 0 : i32
    %c0_i32_2 = arith.constant 0 : i32
    return %arg0, %c0_i32, %c0_i32_0, %c0_i32_1 : i32, i32, i32, i32
  }
  func.func @transform_3(%arg0: i32, %arg1: i32, %arg2: i32) -> (i32, i32) {
    %c0_i32 = arith.constant 0 : i32
    %c0_i32_0 = arith.constant 0 : i32
    %c0_i32_1 = arith.constant 0 : i32
    return %c0_i32, %c0_i32_0 : i32, i32
  }
  func.func @transform_4(%arg0: i32, %arg1: i32, %arg2: i32) -> (i32, i32) {
    %c0_i32 = arith.constant 0 : i32
    %c0_i32_0 = arith.constant 0 : i32
    %c0_i32_1 = arith.constant 0 : i32
    return %c0_i32, %c0_i32_0 : i32, i32
  }
  func.func @transform_5(%arg0: i32, %arg1: i32, %arg2: i32) -> (i32, i32, i32) {
    %c0_i32 = arith.constant 0 : i32
    %c0_i32_0 = arith.constant 0 : i32
    return %arg0, %arg1, %c0_i32 : i32, i32, i32
  }
}

</mosaic_0001>

<bundles_post_ra>
// kernel: tpu_custom_call.1
= control target key start
LH: loop header
LB: loop body
LE: loop exit
PB: predicated region body
PF: predicated region fallthrough
CT: control target
= control target key end

     0   :  { %s3596_s0 = inlined_call_operand.hbm [shape: f32[2,4,128,128], index: 0, kind: input, shape index: {}]   ;;  %s3597_s1 = inlined_call_operand.hbm [shape: f32[2,4,128,128], index: 1, kind: input, shape index: {}]   ;;  %s3598_s2 = inlined_call_operand.hbm [shape: f32[2,4,128,128], index: 2, kind: input, shape index: {}]   ;;  %s3599_s3 = inlined_call_operand.vmem [shape: f32[512,32], index: 3, kind: input, shape index: {}]   ;;  %s3600_s4 = inlined_call_operand.vmem [shape: f32[1,32], index: 4, kind: input, shape index: {}]   ;;  %s3601_s5 = inlined_call_operand.vmem [shape: f32[2,128,32], index: 5, kind: output, shape index: {}]  }
   0x1   :  { %3616 = sst [smem:[#allocation16_spill]] %s3597_s1 }
   0x2   :  { %3617 = sst [smem:[#allocation17_spill]] %s3598_s2 }
   0x3   :  { %3618 = sst [smem:[#allocation18_spill]] %s3599_s3 }
   0x4   :  { %3619 = sst [smem:[#allocation19_spill]] %s3600_s4 }
   0x5   :  { %3620 = sst [smem:[#allocation20_spill]] %s3601_s5 }
   0x6   :  { %10 = vsyncpa [#allocation4], 0 }
   0x7   :  { %12 = vsyncpa [#allocation4 + $0x1], 0 }
   0x8   :  { %13 = vsyncpa [#allocation6], 0 }
   0x9   :  { %15 = vsyncpa [#allocation6 + $0x1], 0  ;;  %s2811_s18 = smov 0   ;;  %s2813_s19 = smov 0  }
   0xa   :  { %s2815_s20 = smov 0   ;;  %s2817_s21 = smov 0  }
   0xb   :  { %s2819_s22 = smov 0   ;;  %s2821_s23 = smov 0  }
   0xc   :  { %s2823_s24 = smov 0   ;;  %s2825_s25 = smov 0  }
   0xd   :  { %s2827_s26 = smov 0   ;;  %s2829_s27 = smov 0  }
   0xe   :  { %s2831_s28 = smov 0  }
   0xf LB: > { %3621 = sst [smem:[#allocation10_spill]] %s2757_s24  ;;  %s3602_s29 = sadd.s32 4294967295, %s2773_s28   ;;  %s2773_s28 = sphi %s2831_s28, %s21_s28   ;;  %s2769_s27 = sphi %s2829_s27, %s3660_s27   ;;  %s2765_s26 = sphi %s2827_s26, %s3651_s26   ;;  %s2761_s25 = sphi %s2825_s25, %s3659_s25   ;;  %s2757_s24 = sphi %s2823_s24, %s3650_s24   ;;  %s2753_s23 = sphi %s2821_s23, %s3658_s23   ;;  %s2749_s22 = sphi %s2819_s22, %s3657_s22   ;;  %s2745_s21 = sphi %s2817_s21, %s3656_s21   ;;  %s2741_s20 = sphi %s2815_s20, %s3655_s20   ;;  %s2737_s19 = sphi %s2813_s19, %s3654_s19   ;;  %s2733_s18 = sphi %s2811_s18, %s3653_s18  }
  0x10   : > { %3622 = sst [smem:[#allocation11_spill]] %s2761_s25  ;;  %p59_p0 = scmp.eq.s32.totalorder %s2773_s28, 0 }
  0x11   : > { %3623 = sst [smem:[#allocation12_spill]] %s2765_s26  ;;  %p2869_p1 = scmp.eq.s32.totalorder %s3602_s29, 0 }
  0x12   : > { %p84_p2 = scmp.ne.s32.totalorder %s2741_s20, %s2737_s19  ;;  %p90_p3 = scmp.ne.s32.totalorder %s2737_s19, %s2733_s18 }
  0x13   : > { %p2375_p5 = scmp.lt.s32.totalorder %s2773_s28, 4  ;;  %s242_s9 = sand.u32 1, %s2773_s28  }
  0x14   : > { %p86_p4 = por %p84_p2, %p59_p0  ;;  %p2882_p6 = por %p90_p3, %p2869_p1 }
  0x15   : > { %s244_s10 = sand.u32 1, %s2741_s20   ;;  %s1921_s12 = sshll.u32 %s2769_s27, 13 }
  0x16   : > { %s3625_s8 = scalar_select %p2882_p6, 1, 0 }
  0x17   : > { %s2888_s11 = sshll.u32 %s244_s10, 9  ;;  %s3627_s1 = sld [smem:[#allocation16_spill]] }
  0x18   : > { %3626 = sst [smem:[#allocation13_spill]] %s3625_s8  ;;  %s246_s16 = scalar_lea.vmem [#allocation5], %s2888_s11 }
  0x19   : > { %s253_s17 = sshll.u32 %s246_s16, 4  ;;  %p2897_p7 = pnand %p2375_p5, %p86_p4  ;;  %s254_s17 = int_to_ptr.vmem [resolvable:$true] %s253_s17 }
  0x1a   : > { %s3629_s2 = sld [smem:[#allocation17_spill]]  ;;  %s2906_s30 = scalar_lea.sflag [#allocation6], %s242_s9 }
  0x1b   : > { %p2597_p8 = pneg %p2897_p7  ;;  %s2608_s13 = scalar_lea.vmem %s254_s17, 8192 }
  0x1c   : > { %p2609_p9 = scmp.ne.s32.totalorder %s254_s17, %s2608_s13  ;;  %s2775_s14 = smov [#allocation5]  }
  0x1d   : > { %s252_s15 = scalar_lea.hbm %s3627_s1, %s1921_s12  ;;  %s2613_s16 = sshll.u32 %s2775_s14, 4  ;;  %s2614_s16 = int_to_ptr.vmem [resolvable:$false] %s2613_s16 }
  0x1e   : > { %p2611_p10 = pnand %p2609_p9, %p2597_p8  ;;  %s2615_s1 = scalar_lea.vmem %s2614_s16, 16384 }
  0x1f   : > { %p2616_p12 = scmp.lt.s32.totalorder %s254_s17, %s2614_s16  ;;  %p2617_p13 = scmp.lt.s32.totalorder %s2615_s1, %s2608_s13 }
  0x20   : > { %s2904_s10 = scalar_lea.hbm %s3629_s2, %s1921_s12  ;;  %p2612_p11 = pneg %p2611_p10 }
  0x21   : > { %p2618_p2 = por %p2617_p13, %p2616_p12 }
  0x23   : > { %p2619_p3 = pnand %p2618_p2, %p2612_p11 }
  0x25   : > { %2622 = shalt.err (!%p2619_p3)
}
  0x26   : > { %s3603_s29 = smov 128   ;;  %s3605_s7 = smov 8  }
  0x27   : > { %2371 = dma.hbm_to_vmem [thread:$0]  (!%p2897_p7), %s252_s15, 8192, %s254_s17, %s2906_s30, %s3603_s29, %s3603_s29, %s3605_s7  }
  0x28   : > { %s267_s1 = scalar_lea.vmem [#allocation7], %s2888_s11  ;;  %p1854_p4 = scmp.ge.s32.totalorder %s2773_s28, 1 }
  0x29   : > { %s274_s9 = sshll.u32 %s267_s1, 4  ;;  %p282_p9 = scmp.lt.s32.totalorder %s2773_s28, 5  ;;  %s2921_s9 = int_to_ptr.vmem [resolvable:$true] %s274_s9 }
  0x2a   : > { %s33_s13 = sadd.s32 1, %s2765_s26  ;;  %s51_s14 = sadd.s32 1, %s2753_s23 }
  0x2b   : > { %p2924_p10 = pnand %p1854_p4, %p282_p9  ;;  %p34_p11 = scmp.ge.s32.totalorder %s33_s13, 2 }
  0x2c   : > { %p58_p12 = scmp.ne.s32.totalorder %s2753_s23, %s2749_s22  ;;  %p64_p13 = scmp.ne.s32.totalorder %s2749_s22, %s2745_s21 }
  0x2d   : > { %s3662_s13 = smov (%p34_p11, %s33_s13), 0  ;;  %s3632_s11 = sadd.s32 1, %s2769_s27 }
  0x2e   : > { %3631 = sst [smem:[#allocation14_spill]] %s3662_s13  ;;  %s3664_s11 = smov (!%p34_p11, %s3632_s11), %s2769_s27 }
  0x2f   : > { %s45_s15 = ssub.s32 %s2765_s26, %s3662_s13  ;;  %p2943_p2 = por %p59_p0, %p58_p12 }
  0x30   : > { %p42_p3 = scmp.ge.s32.totalorder %s3664_s11, 2  ;;  %p2949_p4 = por %p2869_p1, %p64_p13 }
  0x31   : > { %s3611_s21 = sand.u32 1, %s2753_s23   ;;  %s1920_s1 = sshll.u32 %s2765_s26, 5 }
  0x32   : > { %s3666_s11 = smov (%p42_p3, %s3664_s11), 0  ;;  %s1843_s29 = sshll.u32 %s3611_s21, 8 }
  0x33   : > { %3635 = sst [smem:[#allocation15_spill]] %s3666_s11  ;;  %s44_s7 = ssub.s32 %s2769_s27, %s3666_s11 }
  0x34   : > { %s46_s2 = sor.u32 %s45_s15, %s44_s7  ;;  %p75_p0 = scmp.eq.s32.totalorder %s44_s7, 0 }
  0x35   : > { %p49_p9 = scmp.eq.s32.totalorder %s46_s2, 0  ;;  %s1846_s6 = sshll.u32 %s2769_s27, 6 }
  0x36   : > { %s3636_s13 = sadd.s32 1, %s2741_s20  ;;  %s229_s26 = sadd.s32 %s1920_s1, %s1846_s6 }
  0x37   : > { %s2965_s4 = scalar_select %p75_p0, %s2741_s20, %s3636_s13  }
  0x38   : > { %s2968_s3 = scalar_select %p49_p9, %s2753_s23, %s51_s14  }
  0x39   : > { %s220_s24 = scalar_lea.vmem [#allocation3], %s1843_s29  ;;  %s1847_s25 = sshll.u32 %s229_s26, 7 }
  0x3a   : > { %s232_s5 = sshll.u32 %s220_s24, 4  ;;  %s2975_s11 = scalar_lea.hbm %s3596_s0, %s1847_s25  ;;  %s2970_s5 = int_to_ptr.vmem [resolvable:$true] %s232_s5 }
  0x3b   : > { %p2981_p1 = pnand %p2375_p5, %p2943_p2  ;;  %s2636_s7 = scalar_lea.vmem %s2921_s9, 8192 }
  0x3c   : > { %p2637_p11 = scmp.ne.s32.totalorder %s2921_s9, %s2636_s7  ;;  %s2778_s24 = smov [#allocation7]  }
  0x3d   : > { %s2641_s26 = sshll.u32 %s2778_s24, 4  ;;  %s2642_s26 = int_to_ptr.vmem [resolvable:$false] %s2641_s26 }
  0x3e   : > { %p2639_p12 = pnand %p2637_p11, %p2597_p8  ;;  %s2643_s29 = scalar_lea.vmem %s2642_s26, 16384 }
  0x3f   : > { %p2644_p3 = scmp.lt.s32.totalorder %s2921_s9, %s2642_s26  ;;  %p2645_p0 = scmp.lt.s32.totalorder %s2643_s29, %s2636_s7 }
  0x40   : > { %p2640_p13 = pneg %p2639_p12 }
  0x41   : > { %p2646_p9 = por %p2645_p0, %p2644_p3 }
  0x43   : > { %p2647_p6 = pnand %p2646_p9, %p2640_p13 }
  0x45   : > { %2650 = shalt.err (!%p2647_p6)
}
  0x46   : > { %s3638_s25 = smov 8   ;;  %s3639_s8 = smov 128  }
  0x47   : > { %2374 = dma.hbm_to_vmem [thread:$0]  (!%p2897_p7), %s2904_s10, 8192, %s2921_s9, %s2906_s30, %s3639_s8, %s3639_s8, %s3638_s25  }
  0x48   : > { %s3640_s13 = sand.u32 1, %s2753_s23   ;;  %p2653_p5 = pneg %p2981_p1 }
  0x49   : > { %s217_s14 = scalar_lea.sflag [#allocation4], %s3640_s13  ;;  %s2664_s15 = scalar_lea.vmem %s2970_s5, 4096 }
  0x4a   : > { %p2665_p6 = scmp.ne.s32.totalorder %s2970_s5, %s2664_s15  ;;  %s2779_s18 = smov [#allocation3]  }
  0x4b   : > { %s2669_s17 = sshll.u32 %s2779_s18, 4  ;;  %s2670_s17 = int_to_ptr.vmem [resolvable:$false] %s2669_s17 }
  0x4c   : > { %p2667_p8 = pnand %p2665_p6, %p2653_p5  ;;  %s2671_s21 = scalar_lea.vmem %s2670_s17, 8192 }
  0x4d   : > { %p2672_p11 = scmp.lt.s32.totalorder %s2970_s5, %s2670_s17  ;;  %p2673_p12 = scmp.lt.s32.totalorder %s2671_s21, %s2664_s15 }
  0x4e   : > { %p2668_p2 = pneg %p2667_p8 }
  0x4f   : > { %p2674_p13 = por %p2673_p12, %p2672_p11 }
  0x51   : > { %p2675_p3 = pnand %p2674_p13, %p2668_p2 }
  0x53   : > { %2678 = shalt.err (!%p2675_p3)
}
  0x54   : > { %2368 = dma.hbm_to_vmem [thread:$0]  (!%p2981_p1), %s2975_s11, 4096, %s2970_s5, %s217_s14, %s3639_s8, %s3639_s8, %s3638_s25  }
  0x55   : > { %286 = sbr.rel (%p2924_p10) target bundleno = 1440 (0x5a0), region = 40  ;;  %s288_s30 = sand.u32 (!%p2924_p10), 1, %s2749_s22  }
  0x56   : > { %s1855_s10 = sshll.u32 (!%p2924_p10), %s288_s30, 8  ;;  %s289_s9 = scalar_lea.sflag (!%p2924_p10), [#allocation4], %s288_s30 }
  0x57   : > { %s3016_s1 = scalar_lea.vmem (!%p2924_p10), [#allocation3], %s1855_s10 }
  0x5a   : > { %2724 = dma.done.wait (%p2949_p4), %s289_s9, 4096  }
  0x5b   : > { %2726 = vsyncadd (%p2949_p4), %s289_s9, 4294963200  ;;  %s3641_s6 = sadd.s32 4294967295, %s2773_s28   ;;  %s3642_s2 = sld [smem:[#allocation13_spill]] }
  0x5c   : > { %s297_s5 = sand.u32 1, %s3641_s6   ;;  %s299_s11 = sand.u32 1, %s2737_s19  }
  0x5d   : > { %s3025_s12 = sshll.u32 %s299_s11, 9  ;;  %s298_s7 = scalar_lea.sflag [#allocation6], %s297_s5 }
  0x5e   : > { %s301_s24 = scalar_lea.vmem [#allocation5], %s3025_s12 }
  0x61   : > { %p3643_p7 = scmp.ne.s32.totalorder %s3642_s2, 0 }
  0x63   : > { %2728 = dma.done.wait (%p3643_p7), %s298_s7, 16384  }
  0x64   : > { %2730 = vsyncadd (%p3643_p7), %s298_s7, 4294950912  ;;  %s3644_s26 = sld [smem:[#allocation11_spill]]  ;;  %s310_s14 = scalar_lea.vmem [#allocation7], %s3025_s12 }
  0x65   : > { %s3645_s8 = sld [smem:[#allocation20_spill]] }
  0x66   : > { %s3646_s15 = sld [smem:[#allocation10_spill]] }
  0x6a   : > { %p354_p10 = scmp.lt.s32.totalorder %s3644_s26, 1 }
  0x6c   : > { %s3668_s26 = smov (!%p354_p10, %s3644_s26), 1  ;;  %p1860_p4 = scmp.ne.s32.totalorder %s3646_s15, 0 }
  0x6d   : > { %s1923_s16 = sshll.u32 %s3668_s26, 7 }
  0x6e   : > { %s3037_s13 = scalar_lea.vmem %s3645_s8, %s1923_s16  ;;  %366 = sbr.rel (%p1860_p4) target bundleno = 124 (0x7c), region = 56 }
  0x73   : > { %vm367_vm0 = vcmask 261120   ;;  %v2780_v0 = vmov 0.0  }
  0x74   : > { %368 = vst.msk [vmem:[#allocation2] sm:$0xff] %vm367_vm0, %v2780_v0  ;;  %369 = vst.msk [vmem:[#allocation2 + $0x8] sm:$0xff] %vm367_vm0, %v2780_v0 }
  0x75   : > { %370 = vst.msk [vmem:[#allocation2 + $0x10] sm:$0xff] %vm367_vm0, %v2780_v0  ;;  %371 = vst.msk [vmem:[#allocation2 + $0x18] sm:$0xff] %vm367_vm0, %v2780_v0 }
  0x76   : > { %372 = vst.msk [vmem:[#allocation2 + $0x20] sm:$0xff] %vm367_vm0, %v2780_v0  ;;  %373 = vst.msk [vmem:[#allocation2 + $0x28] sm:$0xff] %vm367_vm0, %v2780_v0 }
  0x77   : > { %374 = vst.msk [vmem:[#allocation2 + $0x30] sm:$0xff] %vm367_vm0, %v2780_v0  ;;  %375 = vst.msk [vmem:[#allocation2 + $0x38] sm:$0xff] %vm367_vm0, %v2780_v0 }
  0x78   : > { %376 = vst.msk [vmem:[#allocation2 + $0x40] sm:$0xff] %vm367_vm0, %v2780_v0  ;;  %377 = vst.msk [vmem:[#allocation2 + $0x48] sm:$0xff] %vm367_vm0, %v2780_v0 }
  0x79   : > { %378 = vst.msk [vmem:[#allocation2 + $0x50] sm:$0xff] %vm367_vm0, %v2780_v0  ;;  %379 = vst.msk [vmem:[#allocation2 + $0x58] sm:$0xff] %vm367_vm0, %v2780_v0 }
  0x7a   : > { %380 = vst.msk [vmem:[#allocation2 + $0x60] sm:$0xff] %vm367_vm0, %v2780_v0  ;;  %381 = vst.msk [vmem:[#allocation2 + $0x68] sm:$0xff] %vm367_vm0, %v2780_v0 }
  0x7b   : > { %382 = vst.msk [vmem:[#allocation2 + $0x70] sm:$0xff] %vm367_vm0, %v2780_v0  ;;  %383 = vst.msk [vmem:[#allocation2 + $0x78] sm:$0xff] %vm367_vm0, %v2780_v0 }
  0x7c PF: > { %s3647_s18 = sld [smem:[#allocation10_spill]]  ;;  %v385_v1 = vld [vmem:[%s3016_s1] sm:$0xff]  ;;  %v386_v18 = vld [vmem:[%s3016_s1 + $0x8] sm:$0xff]  ;;  %v387_v19 = vld [vmem:[%s3016_s1 + $0x10] sm:$0xff]  ;;  %v581_v39 = vlaneseq  ;;  %vm1603_vm2 = vcmask 261120  }
  0x7d   : > { %2167 = vmatprep.mubr.f32.mxu0 %v385_v1  ;;  %v388_v20 = vld [vmem:[%s3016_s1 + $0x18] sm:$0xff]  ;;  %v389_v21 = vld [vmem:[%s3016_s1 + $0x20] sm:$0xff]  ;;  %v390_v22 = vld [vmem:[%s3016_s1 + $0x28] sm:$0xff] }
  0x7e   : > { %v391_v23 = vld [vmem:[%s3016_s1 + $0x30] sm:$0xff]  ;;  %v392_v24 = vld [vmem:[%s3016_s1 + $0x38] sm:$0xff]  ;;  %v393_v25 = vld [vmem:[%s3016_s1 + $0x40] sm:$0xff]  ;;  %v3108_v40 = vand.u32 127, %v581_v39 }
  0x7f   : > { %v394_v26 = vld [vmem:[%s3016_s1 + $0x48] sm:$0xff]  ;;  %v395_v27 = vld [vmem:[%s3016_s1 + $0x50] sm:$0xff]  ;;  %v396_v28 = vld [vmem:[%s3016_s1 + $0x58] sm:$0xff] }
  0x80   : > { %v397_v29 = vld [vmem:[%s3016_s1 + $0x60] sm:$0xff]  ;;  %v398_v30 = vld [vmem:[%s3016_s1 + $0x68] sm:$0xff]  ;;  %v399_v31 = vld [vmem:[%s3016_s1 + $0x70] sm:$0xff]  ;;  %vm583_vm1 = vcmp.lt.s32.totalorder %v3108_v40, 8 }
  0x81   : > { %v400_v32 = vld [vmem:[%s3016_s1 + $0x78] sm:$0xff] }
  0x82   : > { %s3058_s17 = sshll.u32 %s3647_s18, 8  ;;  %p1916_p1 = scmp.ne.s32.totalorder %s3647_s18, 1 }
  0x83   : > { %s3064_s21 = scalar_lea.vmem %s301_s24, %s3058_s17 [#allocation5]  ;;  %s3100_s30 = scalar_lea.vmem %s310_s14, %s3058_s17 [#allocation7] }
  0x84   : > { %v418_v2 = vld [vmem:[%s3064_s21 + $0x78] sm:$0xff]  ;;  %v417_v3 = vld [vmem:[%s3064_s21 + $0x70] sm:$0xff]  ;;  %v416_v4 = vld [vmem:[%s3064_s21 + $0x68] sm:$0xff]  ;;  %s3649_s11 = sld [smem:[#allocation19_spill]] (!%p1916_p1) }
  0x85   : > { %2135 = vmatprep.subr.mxu0 %v418_v2  ;;  %v415_v5 = vld [vmem:[%s3064_s21 + $0x60] sm:$0xff]  ;;  %v414_v6 = vld [vmem:[%s3064_s21 + $0x58] sm:$0xff]  ;;  %v413_v7 = vld [vmem:[%s3064_s21 + $0x50] sm:$0xff] }
  0x86   : > { %2136 = vmatpush3.xpose.msra.mxu0 %v418_v2  ;;  %v412_v8 = vld [vmem:[%s3064_s21 + $0x48] sm:$0xff]  ;;  %v411_v9 = vld [vmem:[%s3064_s21 + $0x40] sm:$0xff]  ;;  %v410_v10 = vld [vmem:[%s3064_s21 + $0x38] sm:$0xff] }
  0x87   : > { %2137 = vmatprep.subr.mxu0 %v417_v3  ;;  %v409_v11 = vld [vmem:[%s3064_s21 + $0x30] sm:$0xff]  ;;  %v408_v12 = vld [vmem:[%s3064_s21 + $0x28] sm:$0xff]  ;;  %v407_v13 = vld [vmem:[%s3064_s21 + $0x20] sm:$0xff] }
  0x88   : > { %v406_v14 = vld [vmem:[%s3064_s21 + $0x18] sm:$0xff]  ;;  %v405_v15 = vld [vmem:[%s3064_s21 + $0x10] sm:$0xff]  ;;  %v404_v16 = vld [vmem:[%s3064_s21 + $0x8] sm:$0xff] }
  0x89   : > { %v403_v17 = vld [vmem:[%s3064_s21] sm:$0xff]  ;;  %v435_v33 = vld [vmem:[%s3100_s30 + $0x78] sm:$0xff]  ;;  %v434_v34 = vld [vmem:[%s3100_s30 + $0x70] sm:$0xff] }
  0x8a   : > { %2138 = vmatpush3.xpose.msra.mxu0 %v417_v3  ;;  %2191 = vmatprep.subr.mxu1 %v435_v33  ;;  %v433_v35 = vld [vmem:[%s3100_s30 + $0x68] sm:$0xff]  ;;  %v432_v36 = vld [vmem:[%s3100_s30 + $0x60] sm:$0xff]  ;;  %v431_v37 = vld [vmem:[%s3100_s30 + $0x58] sm:$0xff] }
  0x8b   : > { %2139 = vmatprep.subr.mxu0 %v416_v4  ;;  %2192 = vmatpush3.msra.mxu1 %v435_v33  ;;  %v430_v38 = vld [vmem:[%s3100_s30 + $0x50] sm:$0xff]  ;;  %v429_v55 = vld [vmem:[%s3100_s30 + $0x48] sm:$0xff]  ;;  %v428_v58 = vld [vmem:[%s3100_s30 + $0x40] sm:$0xff] }
  0x8c   : > { %2193 = vmatprep.subr.mxu1 %v434_v34  ;;  %v427_v62 = vld [vmem:[%s3100_s30 + $0x38] sm:$0xff]  ;;  %v426_v1 = vld [vmem:[%s3100_s30 + $0x30] sm:$0xff] }
  0x8d   : > { %2194 = vmatpush3.msra.mxu1 %v434_v34 }
  0x8e   : > { %2140 = vmatpush3.xpose.msra.mxu0 %v416_v4  ;;  %2195 = vmatprep.subr.mxu1 %v433_v35  ;;  %v425_v4 = vld [vmem:[%s3100_s30 + $0x28] sm:$0xff] }
  0x8f   : > { %2141 = vmatprep.subr.mxu0 %v415_v5  ;;  %2196 = vmatpush3.msra.mxu1 %v433_v35 }
  0x90   : > { %2197 = vmatprep.subr.mxu1 %v432_v36 }
  0x91   : > { %2198 = vmatpush3.msra.mxu1 %v432_v36 }
  0x92   : > { %2142 = vmatpush3.xpose.msra.mxu0 %v415_v5  ;;  %2199 = vmatprep.subr.mxu1 %v431_v37 }
  0x93   : > { %2143 = vmatprep.subr.mxu0 %v414_v6  ;;  %2200 = vmatpush3.msra.mxu1 %v431_v37 }
  0x94   : > { %2201 = vmatprep.subr.mxu1 %v430_v38 }
  0x95   : > { %2202 = vmatpush3.msra.mxu1 %v430_v38 }
  0x96   : > { %2144 = vmatpush3.xpose.msra.mxu0 %v414_v6  ;;  %2203 = vmatprep.subr.mxu1 %v429_v55 }
  0x97   : > { %2145 = vmatprep.subr.mxu0 %v413_v7  ;;  %2204 = vmatpush3.msra.mxu1 %v429_v55 }
  0x98   : > { %2205 = vmatprep.subr.mxu1 %v428_v58 }
  0x99   : > { %2206 = vmatpush3.msra.mxu1 %v428_v58 }
  0x9a   : > { %2146 = vmatpush3.xpose.msra.mxu0 %v413_v7  ;;  %2207 = vmatprep.subr.mxu1 %v427_v62 }
  0x9b   : > { %2147 = vmatprep.subr.mxu0 %v412_v8  ;;  %2208 = vmatpush3.msra.mxu1 %v427_v62 }
  0x9c   : > { %2209 = vmatprep.subr.mxu1 %v426_v1 }
  0x9d   : > { %2210 = vmatpush3.msra.mxu1 %v426_v1 }
  0x9e   : > { %2148 = vmatpush3.xpose.msra.mxu0 %v412_v8  ;;  %2211 = vmatprep.subr.mxu1 %v425_v4  ;;  %v424_v8 = vld [vmem:[%s3100_s30 + $0x20] sm:$0xff] }
  0x9f   : > { %2149 = vmatprep.subr.mxu0 %v411_v9  ;;  %2212 = vmatpush3.msra.mxu1 %v425_v4 }
  0xa0   : > { %2213 = vmatprep.subr.mxu1 %v424_v8 }
  0xa1   : > { %2214 = vmatpush3.msra.mxu1 %v424_v8  ;;  %v1893_v8 = vld [vmem:[%s3064_s21 + $0xe0] sm:$0xff] }
  0xa2   : > { %2150 = vmatpush3.xpose.msra.mxu0 %v411_v9 }
  0xa3   : > { %2151 = vmatprep.subr.mxu0 %v410_v10 }
  0xa6   : > { %2152 = vmatpush3.xpose.msra.mxu0 %v410_v10 }
  0xa7   : > { %2153 = vmatprep.subr.mxu0 %v409_v11 }
  0xaa   : > { %2154 = vmatpush3.xpose.msra.mxu0 %v409_v11  ;;  %v423_v11 = vld [vmem:[%s3100_s30 + $0x18] sm:$0xff] }
  0xab   : > { %2155 = vmatprep.subr.mxu0 %v408_v12  ;;  %2215 = vmatprep.subr.mxu1 %v423_v11 }
  0xac   : > { %2216 = vmatpush3.msra.mxu1 %v423_v11 }
  0xae   : > { %2156 = vmatpush3.xpose.msra.mxu0 %v408_v12 }
  0xaf   : > { %2157 = vmatprep.subr.mxu0 %v407_v13 }
  0xb2   : > { %2158 = vmatpush3.xpose.msra.mxu0 %v407_v13 }
  0xb3   : > { %2159 = vmatprep.subr.mxu0 %v406_v14 }
  0xb6   : > { %2160 = vmatpush3.xpose.msra.mxu0 %v406_v14 }
  0xb7   : > { %2161 = vmatprep.subr.mxu0 %v405_v15 }
  0xba   : > { %2162 = vmatpush3.xpose.msra.mxu0 %v405_v15  ;;  %v422_v15 = vld [vmem:[%s3100_s30 + $0x10] sm:$0xff] }
  0xbb   : > { %2163 = vmatprep.subr.mxu0 %v404_v16  ;;  %2217 = vmatprep.subr.mxu1 %v422_v15 }
  0xbc   : > { %2218 = vmatpush3.msra.mxu1 %v422_v15  ;;  %v1892_v15 = vld [vmem:[%s3064_s21 + $0xd8] sm:$0xff] }
  0xbe   : > { %2164 = vmatpush3.xpose.msra.mxu0 %v404_v16 }
  0xbf   : > { %2165 = vmatprep.subr.mxu0 %v403_v17 }
  0xc2   : > { %2166 = vmatpush3.xpose.msra.mxu0 %v403_v17  ;;  %v421_v17 = vld [vmem:[%s3100_s30 + $0x8] sm:$0xff] }
  0xc3   : > { %2219 = vmatprep.subr.mxu1 %v421_v17 }
  0xc4   : > { %2220 = vmatpush3.msra.mxu1 %v421_v17 }
  0xc5   : > { %2168 = vmatmul.mubr.f32.vlgmr.msra.gmra.mxu0 %v386_v18  ;;  %v420_v18 = vld [vmem:[%s3100_s30] sm:$0xff] }
  0xc6   : > { %2170 = vmatprep.mubr.f32.mxu0 %v387_v19  ;;  %v1896_v19 = vld [vmem:[%s3064_s21 + $0xf8] sm:$0xff]  ;;  %2221 = vmatprep.subr.mxu1 %v420_v18 }
  0xc7   : > { %2222 = vmatpush3.msra.mxu1 %v420_v18 }
  0xc8   : > { %2247 = vmatprep.subr.mxu1 %v1896_v19 }
  0xc9   : > { %2171 = vmatmul.mubr.f32.gmra.mxu0 %v388_v20 }
  0xca   : > { %2173 = vmatprep.mubr.f32.mxu0 %v389_v21 }
  0xcd   : > { %2174 = vmatmul.mubr.f32.gmra.mxu0 %v390_v22 }
  0xce   : > { %2176 = vmatprep.mubr.f32.mxu0 %v391_v23 }
  0xd1   : > { %2177 = vmatmul.mubr.f32.gmra.mxu0 %v392_v24 }
  0xd2   : > { %2179 = vmatprep.mubr.f32.mxu0 %v393_v25 }
  0xd5   : > { %2180 = vmatmul.mubr.f32.gmra.mxu0 %v394_v26 }
  0xd6   : > { %2182 = vmatprep.mubr.f32.mxu0 %v395_v27 }
  0xd9   : > { %2183 = vmatmul.mubr.f32.gmra.mxu0 %v396_v28 }
  0xda   : > { %2185 = vmatprep.mubr.f32.mxu0 %v397_v29 }
  0xdd   : > { %2186 = vmatmul.mubr.f32.gmra.mxu0 %v398_v30 }
  0xde   : > { %2188 = vmatprep.mubr.f32.mxu0 %v399_v31 }
  0xe1   : > { %2189 = vmatmul.mubr.f32.gmra.mxu0 %v400_v32 }
 0x185   : > { %v2169_v41 = vpop.f32.mrf.mxu0 }
 0x186   : > { %v3118_v46 = vsel %vm583_vm1, %v2169_v41, -1e+30 }
 0x187   : > { %v502_v42 = vpop.f32.mrf.mxu0 }
 0x188   : > { %v3113_v43 = vsel %vm583_vm1, %v502_v42, -1e+30 }
 0x189   : > { %600 = vmax.xlane.f32.xlu0 %v3113_v43  ;;  %v2172_v44 = vpop.f32.mrf.mxu0 }
 0x18a   : > { %v3128_v49 = vsel %vm583_vm1, %v2172_v44, -1e+30 }
 0x18b   : > { %v512_v45 = vpop.f32.mrf.mxu0 }
 0x18c   : > { %v3122_v47 = vsel %vm583_vm1, %v512_v45, -1e+30 }
 0x18d   : > { %602 = vmax.xlane.f32.xlu0 %v3118_v46  ;;  %604 = vmax.xlane.f32.xlu1 %v3122_v47  ;;  %v2175_v48 = vpop.f32.mrf.mxu0 }
 0x18e   : > { %v3138_v53 = vsel %vm583_vm1, %v2175_v48, -1e+30 }
 0x18f   : > { %v522_v50 = vpop.f32.mrf.mxu0 }
 0x190   : > { %v3132_v51 = vsel %vm583_vm1, %v522_v50, -1e+30 }
 0x191   : > { %606 = vmax.xlane.f32.xlu1 %v3128_v49  ;;  %608 = vmax.xlane.f32.xlu0 %v3132_v51  ;;  %v2178_v52 = vpop.f32.mrf.mxu0 }
 0x192   : > { %v3150_v59 = vsel %vm583_vm1, %v2178_v52, -1e+30 }
 0x193   : > { %v532_v54 = vpop.f32.mrf.mxu0 }
 0x194   : > { %v3143_v56 = vsel %vm583_vm1, %v532_v54, -1e+30  ;;  %v1895_v54 = vld [vmem:[%s3064_s21 + $0xf0] sm:$0xff] }
 0x195   : > { %610 = vmax.xlane.f32.xlu1 %v3138_v53  ;;  %612 = vmax.xlane.f32.xlu0 %v3143_v56  ;;  %v2181_v57 = vpop.f32.mrf.mxu0 }
 0x196   : > { %v3161_v0 = vsel %vm583_vm1, %v2181_v57, -1e+30 }
 0x197   : > { %v542_v60 = vpop.f32.mrf.mxu0 }
 0x198   : > { %v3154_v61 = vsel %vm583_vm1, %v542_v60, -1e+30 }
 0x199   : > { %614 = vmax.xlane.f32.xlu1 %v3150_v59  ;;  %616 = vmax.xlane.f32.xlu0 %v3154_v61  ;;  %v2184_v63 = vpop.f32.mrf.mxu0 }
 0x19a   : > { %v3173_v6 = vsel %vm583_vm1, %v2184_v63, -1e+30  ;;  %v1894_v63 = vld [vmem:[%s3064_s21 + $0xe8] sm:$0xff] }
 0x19b   : > { %v552_v2 = vpop.f32.mrf.mxu0 }
 0x19c   : > { %v3166_v3 = vsel %vm583_vm1, %v552_v2, -1e+30 }
 0x19d   : > { %618 = vmax.xlane.f32.xlu1 %v3161_v0  ;;  %620 = vmax.xlane.f32.xlu0 %v3166_v3  ;;  %v2187_v5 = vpop.f32.mrf.mxu0 }
 0x19e   : > { %v3185_v12 = vsel %vm583_vm1, %v2187_v5, -1e+30 }
 0x19f   : > { %v562_v7 = vpop.f32.mrf.mxu0 }
 0x1a0   : > { %v3178_v9 = vsel %vm583_vm1, %v562_v7, -1e+30 }
 0x1a1   : > { %622 = vmax.xlane.f32.xlu1 %v3173_v6  ;;  %624 = vmax.xlane.f32.xlu0 %v3178_v9  ;;  %v2190_v10 = vpop.f32.mrf.mxu0 }
 0x1a2   : > { %v3196_v16 = vsel %vm583_vm1, %v2190_v10, -1e+30 }
 0x1a3   : > { %v572_v13 = vpop.f32.mrf.mxu0 }
 0x1a4   : > { %v3189_v14 = vsel %vm583_vm1, %v572_v13, -1e+30 }
 0x1a5   : > { %626 = vmax.xlane.f32.xlu1 %v3185_v12  ;;  %628 = vmax.xlane.f32.xlu0 %v3189_v14 }
 0x1a9   : > { %630 = vmax.xlane.f32.xlu1 %v3196_v16 }
 0x212   : > { %v601_v20 = vpop.xlane.xlu0 %600 }
 0x213   : > { %v632_v21 = vsub.f32 %v3113_v43, %v601_v20 }
 0x215   : > { %v648_v22 = vmul.f32 1.442695, %v632_v21 }
 0x216   : > { %v603_v23 = vpop.xlane.xlu0 %602  ;;  %v605_v24 = vpop.xlane.xlu1 %604 }
 0x217   : > { %2467 = vpow2.f32 %v648_v22  ;;  %v633_v25 = vsub.f32 %v3118_v46, %v603_v23  ;;  %v634_v26 = vsub.f32 %v3122_v47, %v605_v24  ;;  %v1890_v22 = vld [vmem:[%s3064_s21 + $0xc8] sm:$0xff] }
 0x219   : > { %v650_v27 = vmul.f32 1.442695, %v633_v25  ;;  %v652_v28 = vmul.f32 1.442695, %v634_v26  ;;  %v1889_v25 = vld [vmem:[%s3064_s21 + $0xc0] sm:$0xff] }
 0x21a   : > { %v607_v29 = vpop.xlane.xlu1 %606  ;;  %v609_v30 = vpop.xlane.xlu0 %608 }
 0x21b   : > { %2469 = vpow2.f32 %v650_v27  ;;  %v635_v31 = vsub.f32 %v3128_v49, %v607_v29  ;;  %v636_v32 = vsub.f32 %v3132_v51, %v609_v30  ;;  %v1863_v27 = vld [vmem:[%s3016_s1 + $0x80] sm:$0xff]  ;;  %v1888_v29 = vld [vmem:[%s3064_s21 + $0xb8] sm:$0xff]  ;;  %v1887_v30 = vld [vmem:[%s3064_s21 + $0xb0] sm:$0xff] }
 0x21c   : > { %2471 = vpow2.f32 %v652_v28 }
 0x21d   : > { %v654_v33 = vmul.f32 1.442695, %v635_v31  ;;  %v656_v34 = vmul.f32 1.442695, %v636_v32  ;;  %v1886_v31 = vld [vmem:[%s3064_s21 + $0xa8] sm:$0xff]  ;;  %v1885_v32 = vld [vmem:[%s3064_s21 + $0xa0] sm:$0xff] }
 0x21e   : > { %v611_v35 = vpop.xlane.xlu1 %610  ;;  %v613_v36 = vpop.xlane.xlu0 %612 }
 0x21f   : > { %2473 = vpow2.f32 %v654_v33  ;;  %v637_v37 = vsub.f32 %v3138_v53, %v611_v35  ;;  %v638_v38 = vsub.f32 %v3143_v56, %v613_v36  ;;  %v1884_v33 = vld [vmem:[%s3064_s21 + $0x98] sm:$0xff]  ;;  %v1882_v35 = vld [vmem:[%s3064_s21 + $0x88] sm:$0xff]  ;;  %v1881_v36 = vld [vmem:[%s3064_s21 + $0x80] sm:$0xff] }
 0x220   : > { %2475 = vpow2.f32 %v656_v34  ;;  %v1883_v34 = vld [vmem:[%s3064_s21 + $0x90] sm:$0xff] }
 0x221   : > { %v658_v39 = vmul.f32 1.442695, %v637_v37  ;;  %v660_v41 = vmul.f32 1.442695, %v638_v38  ;;  %v1864_v37 = vld [vmem:[%s3016_s1 + $0x88] sm:$0xff]  ;;  %v1865_v38 = vld [vmem:[%s3016_s1 + $0x90] sm:$0xff] }
 0x222   : > { %v615_v42 = vpop.xlane.xlu1 %614  ;;  %v617_v43 = vpop.xlane.xlu0 %616 }
 0x223   : > { %2477 = vpow2.f32 %v658_v39  ;;  %v639_v44 = vsub.f32 %v3150_v59, %v615_v42  ;;  %v640_v45 = vsub.f32 %v3154_v61, %v617_v43  ;;  %v1866_v39 = vld [vmem:[%s3016_s1 + $0x98] sm:$0xff]  ;;  %v1868_v42 = vld [vmem:[%s3016_s1 + $0xa8] sm:$0xff]  ;;  %v1869_v43 = vld [vmem:[%s3016_s1 + $0xb0] sm:$0xff] }
 0x224   : > { %v3211_v46 = vpop.eup %2467  ;;  %2479 = vpow2.f32 %v660_v41  ;;  %v1867_v41 = vld [vmem:[%s3016_s1 + $0xa0] sm:$0xff] }
 0x225   : > { %v662_v47 = vmul.f32 1.442695, %v639_v44  ;;  %v664_v48 = vmul.f32 1.442695, %v640_v45  ;;  %2223 = vmatprep.mubr.f32.mxu1 %v3211_v46  ;;  %v1870_v44 = vld [vmem:[%s3016_s1 + $0xb8] sm:$0xff]  ;;  %v1871_v45 = vld [vmem:[%s3016_s1 + $0xc0] sm:$0xff] }
 0x226   : > { %v619_v49 = vpop.xlane.xlu1 %618  ;;  %v621_v50 = vpop.xlane.xlu0 %620 }
 0x227   : > { %2481 = vpow2.f32 %v662_v47  ;;  %v641_v51 = vsub.f32 %v3161_v0, %v619_v49  ;;  %v642_v52 = vsub.f32 %v3166_v3, %v621_v50  ;;  %v1872_v47 = vld [vmem:[%s3016_s1 + $0xc8] sm:$0xff]  ;;  %v1874_v49 = vld [vmem:[%s3016_s1 + $0xd8] sm:$0xff]  ;;  %v1875_v50 = vld [vmem:[%s3016_s1 + $0xe0] sm:$0xff] }
 0x228   : > { %v3216_v53 = vpop.eup %2469  ;;  %2483 = vpow2.f32 %v664_v48  ;;  %v1873_v48 = vld [vmem:[%s3016_s1 + $0xd0] sm:$0xff] }
 0x229   : > { %v3219_v55 = vpop.eup %2471  ;;  %v666_v56 = vmul.f32 1.442695, %v641_v51  ;;  %v668_v57 = vmul.f32 1.442695, %v642_v52  ;;  %2224 = vmatmul.mubr.f32.vlgmr.msra.gmra.mxu1 %v3216_v53  ;;  %v1876_v51 = vld [vmem:[%s3016_s1 + $0xe8] sm:$0xff]  ;;  %v1877_v52 = vld [vmem:[%s3016_s1 + $0xf0] sm:$0xff] }
 0x22a   : > { %2248 = vmatpush3.xpose.msra.mxu1 %v1896_v19  ;;  %2226 = vmatprep.mubr.f32.mxu1 %v3219_v55  ;;  %v623_v58 = vpop.xlane.xlu1 %622  ;;  %v625_v59 = vpop.xlane.xlu0 %624 }
 0x22b   : > { %2485 = vpow2.f32 %v666_v56  ;;  %v643_v60 = vsub.f32 %v3173_v6, %v623_v58  ;;  %v644_v61 = vsub.f32 %v3178_v9, %v625_v59  ;;  %2249 = vmatprep.subr.mxu1 %v1895_v54 }
 0x22c   : > { %v3225_v62 = vpop.eup %2473  ;;  %2487 = vpow2.f32 %v668_v57 }
 0x22d   : > { %v3228_v0 = vpop.eup %2475  ;;  %v670_v1 = vmul.f32 1.442695, %v643_v60  ;;  %v672_v2 = vmul.f32 1.442695, %v644_v61  ;;  %2227 = vmatmul.mubr.f32.gmra.mxu1 %v3225_v62 }
 0x22e   : > { %2250 = vmatpush3.xpose.msra.mxu1 %v1895_v54  ;;  %2229 = vmatprep.mubr.f32.mxu1 %v3228_v0  ;;  %v627_v3 = vpop.xlane.xlu1 %626  ;;  %v629_v4 = vpop.xlane.xlu0 %628  ;;  %v1878_v54 = vld [vmem:[%s3016_s1 + $0xf8] sm:$0xff]  ;;  %s3648_s1 = sld [smem:[#allocation18_spill]] }
 0x22f   : > { %2489 = vpow2.f32 %v670_v1  ;;  %v645_v5 = vsub.f32 %v3185_v12, %v627_v3  ;;  %v646_v6 = vsub.f32 %v3189_v14, %v629_v4  ;;  %2251 = vmatprep.subr.mxu1 %v1894_v63  ;;  %v1913_v3 = vld [vmem:[%s3100_s30 + $0xf0] sm:$0xff]  ;;  %v1912_v4 = vld [vmem:[%s3100_s30 + $0xe8] sm:$0xff] }
 0x230   : > { %v3234_v7 = vpop.eup %2477  ;;  %2491 = vpow2.f32 %v672_v2  ;;  %v1914_v2 = vld [vmem:[%s3100_s30 + $0xf8] sm:$0xff] }
 0x231   : > { %v3237_v9 = vpop.eup %2479  ;;  %v674_v10 = vmul.f32 1.442695, %v645_v5  ;;  %v676_v11 = vmul.f32 1.442695, %v646_v6  ;;  %2230 = vmatmul.mubr.f32.gmra.mxu1 %v3234_v7  ;;  %v1911_v6 = vld [vmem:[%s3100_s30 + $0xe0] sm:$0xff] }
 0x232   : > { %2252 = vmatpush3.xpose.msra.mxu1 %v1894_v63  ;;  %2232 = vmatprep.mubr.f32.mxu1 %v3237_v9  ;;  %v631_v13 = vpop.xlane.xlu1 %630 }
 0x233   : > { %2493 = vpow2.f32 %v674_v10  ;;  %v647_v12 = vsub.f32 %v3196_v16, %v631_v13  ;;  %2253 = vmatprep.subr.mxu1 %v1893_v8  ;;  %v1891_v16 = vld [vmem:[%s3064_s21 + $0xd0] sm:$0xff] }
 0x234   : > { %v3242_v14 = vpop.eup %2481  ;;  %2495 = vpow2.f32 %v676_v11  ;;  %v1909_v11 = vld [vmem:[%s3100_s30 + $0xd0] sm:$0xff]  ;;  %s3461_s6 = scalar_lea.vmem %s3648_s1, %s3058_s17 }
 0x235   : > { %v3245_v17 = vpop.eup %2483  ;;  %v678_v18 = vmul.f32 1.442695, %v647_v12  ;;  %2233 = vmatmul.mubr.f32.gmra.mxu1 %v3242_v14 }
 0x236   : > { %2254 = vmatpush3.xpose.msra.mxu1 %v1893_v8  ;;  %2235 = vmatprep.mubr.f32.mxu1 %v3245_v17  ;;  %v1910_v8 = vld [vmem:[%s3100_s30 + $0xd8] sm:$0xff] }
 0x237   : > { %2497 = vpow2.f32 %v678_v18  ;;  %2255 = vmatprep.subr.mxu1 %v1892_v15 }
 0x238   : > { %v3249_v19 = vpop.eup %2485 }
 0x239   : > { %v3252_v20 = vpop.eup %2487  ;;  %2236 = vmatmul.mubr.f32.gmra.mxu1 %v3249_v19 }
 0x23a   : > { %2256 = vmatpush3.xpose.msra.mxu1 %v1892_v15  ;;  %2238 = vmatprep.mubr.f32.mxu1 %v3252_v20 }
 0x23b   : > { %2257 = vmatprep.subr.mxu1 %v1891_v16 }
 0x23c   : > { %v3256_v21 = vpop.eup %2489 }
 0x23d   : > { %v3259_v23 = vpop.eup %2491  ;;  %2239 = vmatmul.mubr.f32.gmra.mxu1 %v3256_v21 }
 0x23e   : > { %2258 = vmatpush3.xpose.msra.mxu1 %v1891_v16  ;;  %2241 = vmatprep.mubr.f32.mxu1 %v3259_v23 }
 0x23f   : > { %2259 = vmatprep.subr.mxu1 %v1890_v22 }
 0x240   : > { %v3263_v24 = vpop.eup %2493 }
 0x241   : > { %v3266_v26 = vpop.eup %2495  ;;  %2242 = vmatmul.mubr.f32.gmra.mxu1 %v3263_v24 }
 0x242   : > { %2260 = vmatpush3.xpose.msra.mxu1 %v1890_v22  ;;  %2244 = vmatprep.mubr.f32.mxu1 %v3266_v26 }
 0x243   : > { %2261 = vmatprep.subr.mxu1 %v1889_v25 }
 0x244   : > { %v3271_v28 = vpop.eup %2497 }
 0x245   : > { %2245 = vmatmul.mubr.f32.gmra.mxu1 %v3271_v28 }
 0x246   : > { %2262 = vmatpush3.xpose.msra.mxu1 %v1889_v25  ;;  %2279 = vmatprep.mubr.f32.mxu1 %v1863_v27 }
 0x247   : > { %2263 = vmatprep.subr.mxu1 %v1888_v29 }
 0x24a   : > { %2264 = vmatpush3.xpose.msra.mxu1 %v1888_v29 }
 0x24b   : > { %2265 = vmatprep.subr.mxu1 %v1887_v30 }
 0x24e   : > { %2266 = vmatpush3.xpose.msra.mxu1 %v1887_v30 }
 0x24f   : > { %2267 = vmatprep.subr.mxu1 %v1886_v31 }
 0x252   : > { %2268 = vmatpush3.xpose.msra.mxu1 %v1886_v31 }
 0x253   : > { %2269 = vmatprep.subr.mxu1 %v1885_v32 }
 0x256   : > { %2270 = vmatpush3.xpose.msra.mxu1 %v1885_v32 }
 0x257   : > { %2271 = vmatprep.subr.mxu1 %v1884_v33 }
 0x25a   : > { %2272 = vmatpush3.xpose.msra.mxu1 %v1884_v33 }
 0x25b   : > { %2273 = vmatprep.subr.mxu1 %v1883_v34 }
 0x25e   : > { %2274 = vmatpush3.xpose.msra.mxu1 %v1883_v34 }
 0x25f   : > { %2275 = vmatprep.subr.mxu1 %v1882_v35 }
 0x262   : > { %2276 = vmatpush3.xpose.msra.mxu1 %v1882_v35 }
 0x263   : > { %2277 = vmatprep.subr.mxu1 %v1881_v36 }
 0x266   : > { %2278 = vmatpush3.xpose.msra.mxu1 %v1881_v36 }
 0x267   : > { %2303 = vmatprep.subr.mxu1 %v1914_v2 }
 0x269   : > { %2280 = vmatmul.mubr.f32.vlgmr.msra.gmra.mxu1 %v1864_v37 }
 0x26a   : > { %2282 = vmatprep.mubr.f32.mxu1 %v1865_v38  ;;  %2304 = vmatpush3.msra.mxu1 %v1914_v2  ;;  %v1904_v2 = vld [vmem:[%s3100_s30 + $0xa8] sm:$0xff] }
 0x26b   : > { %2305 = vmatprep.subr.mxu1 %v1913_v3 }
 0x26c   : > { %2306 = vmatpush3.msra.mxu1 %v1913_v3 }
 0x26d   : > { %2283 = vmatmul.mubr.f32.gmra.mxu1 %v1866_v39  ;;  %2307 = vmatprep.subr.mxu1 %v1912_v4 }
 0x26e   : > { %2285 = vmatprep.mubr.f32.mxu1 %v1867_v41  ;;  %2308 = vmatpush3.msra.mxu1 %v1912_v4  ;;  %v1908_v41 = vld [vmem:[%s3100_s30 + $0xc8] sm:$0xff] }
 0x26f   : > { %2309 = vmatprep.subr.mxu1 %v1911_v6 }
 0x270   : > { %2310 = vmatpush3.msra.mxu1 %v1911_v6  ;;  %v1903_v6 = vld [vmem:[%s3100_s30 + $0xa0] sm:$0xff] }
 0x271   : > { %2286 = vmatmul.mubr.f32.gmra.mxu1 %v1868_v42  ;;  %2311 = vmatprep.subr.mxu1 %v1910_v8 }
 0x272   : > { %2288 = vmatprep.mubr.f32.mxu1 %v1869_v43  ;;  %2312 = vmatpush3.msra.mxu1 %v1910_v8 }
 0x273   : > { %2313 = vmatprep.subr.mxu1 %v1909_v11 }
 0x274   : > { %2314 = vmatpush3.msra.mxu1 %v1909_v11 }
 0x275   : > { %2289 = vmatmul.mubr.f32.gmra.mxu1 %v1870_v44  ;;  %2315 = vmatprep.subr.mxu1 %v1908_v41  ;;  %v1907_v44 = vld [vmem:[%s3100_s30 + $0xc0] sm:$0xff] }
 0x276   : > { %2291 = vmatprep.mubr.f32.mxu1 %v1871_v45  ;;  %2316 = vmatpush3.msra.mxu1 %v1908_v41 }
 0x277   : > { %2317 = vmatprep.subr.mxu1 %v1907_v44 }
 0x278   : > { %2318 = vmatpush3.msra.mxu1 %v1907_v44  ;;  %v1899_v44 = vld [vmem:[%s3100_s30 + $0x80] sm:$0xff] }
 0x279   : > { %2292 = vmatmul.mubr.f32.gmra.mxu1 %v1872_v47 }
 0x27a   : > { %2294 = vmatprep.mubr.f32.mxu1 %v1873_v48  ;;  %v1906_v48 = vld [vmem:[%s3100_s30 + $0xb8] sm:$0xff] }
 0x27b   : > { %2319 = vmatprep.subr.mxu1 %v1906_v48 }
 0x27c   : > { %2320 = vmatpush3.msra.mxu1 %v1906_v48 }
 0x27d   : > { %2295 = vmatmul.mubr.f32.gmra.mxu1 %v1874_v49 }
 0x27e   : > { %2297 = vmatprep.mubr.f32.mxu1 %v1875_v50 }
 0x281   : > { %2298 = vmatmul.mubr.f32.gmra.mxu1 %v1876_v51  ;;  %v1905_v51 = vld [vmem:[%s3100_s30 + $0xb0] sm:$0xff] }
 0x282   : > { %2300 = vmatprep.mubr.f32.mxu1 %v1877_v52  ;;  %2321 = vmatprep.subr.mxu1 %v1905_v51 }
 0x283   : > { %2322 = vmatpush3.msra.mxu1 %v1905_v51 }
 0x284   : > { %2323 = vmatprep.subr.mxu1 %v1904_v2 }
 0x285   : > { %2301 = vmatmul.mubr.f32.gmra.mxu1 %v1878_v54 }
 0x286   : > { %2324 = vmatpush3.msra.mxu1 %v1904_v2 }
 0x287   : > { %2325 = vmatprep.subr.mxu1 %v1903_v6 }
 0x288   : > { %2326 = vmatpush3.msra.mxu1 %v1903_v6 }
 0x2e9   : > { %v3297_v56 = vpop.f32.mrf.mxu1 }
 0x2eb   : > { %v3299_v57 = vpop.f32.mrf.mxu1 }
 0x2ed   : > { %v3301_v58 = vpop.f32.mrf.mxu1 }
 0x2ef   : > { %v3303_v59 = vpop.f32.mrf.mxu1 }
 0x2f1   : > { %v3305_v60 = vpop.f32.mrf.mxu1 }
 0x2f3   : > { %v3307_v61 = vpop.f32.mrf.mxu1 }
 0x2f5   : > { %v3309_v63 = vpop.f32.mrf.mxu1 }
 0x2f7   : > { %v3311_v1 = vpop.f32.mrf.mxu1 }
 0x2f9   : > { %v3316_v5 = vpop.f32.mrf.mxu1 }
 0x2fb   : > { %v3320_v10 = vpop.f32.mrf.mxu1 }
 0x2fd   : > { %v3323_v13 = vpop.f32.mrf.mxu1 }
 0x2ff   : > { %v3325_v12 = vpop.f32.mrf.mxu1 }
 0x301   : > { %v3327_v15 = vpop.f32.mrf.mxu1 }
 0x303   : > { %v3329_v18 = vpop.f32.mrf.mxu1 }
 0x305   : > { %v3331_v16 = vpop.f32.mrf.mxu1 }
 0x307   : > { %v3333_v22 = vpop.f32.mrf.mxu1 }
 0x329   : > { %v2281_v25 = vpop.f32.mrf.mxu1 }
 0x32a   : > { %v3337_v27 = vsel %vm583_vm1, %v2281_v25, -1e+30  ;;  %v1902_v25 = vld [vmem:[%s3100_s30 + $0x98] sm:$0xff] }
 0x32b   : > { %1105 = vmax.xlane.f32.xlu1 %v3337_v27  ;;  %v1008_v29 = vpop.f32.mrf.mxu1  ;;  %2327 = vmatprep.subr.mxu1 %v1902_v25 }
 0x32c   : > { %v3342_v30 = vsel %vm583_vm1, %v1008_v29, -1e+30  ;;  %2328 = vmatpush3.msra.mxu1 %v1902_v25 }
 0x32d   : > { %1103 = vmax.xlane.f32.xlu0 %v3342_v30  ;;  %v2284_v31 = vpop.f32.mrf.mxu1 }
 0x32e   : > { %v3347_v32 = vsel %vm583_vm1, %v2284_v31, -1e+30 }
 0x32f   : > { %1109 = vmax.xlane.f32.xlu1 %v3347_v32  ;;  %v1018_v33 = vpop.f32.mrf.mxu1 }
 0x330   : > { %v3352_v34 = vsel %vm583_vm1, %v1018_v33, -1e+30  ;;  %v1901_v33 = vld [vmem:[%s3100_s30 + $0x90] sm:$0xff] }
 0x331   : > { %1107 = vmax.xlane.f32.xlu0 %v3352_v34  ;;  %v2287_v35 = vpop.f32.mrf.mxu1  ;;  %2329 = vmatprep.subr.mxu1 %v1901_v33 }
 0x332   : > { %v3357_v36 = vsel %vm583_vm1, %v2287_v35, -1e+30  ;;  %2330 = vmatpush3.msra.mxu1 %v1901_v33 }
 0x333   : > { %1113 = vmax.xlane.f32.xlu1 %v3357_v36  ;;  %v1028_v37 = vpop.f32.mrf.mxu1 }
 0x334   : > { %v3362_v38 = vsel %vm583_vm1, %v1028_v37, -1e+30 }
 0x335   : > { %1111 = vmax.xlane.f32.xlu0 %v3362_v38  ;;  %v2290_v39 = vpop.f32.mrf.mxu1 }
 0x336   : > { %v3368_v42 = vsel %vm583_vm1, %v2290_v39, -1e+30  ;;  %v1900_v39 = vld [vmem:[%s3100_s30 + $0x88] sm:$0xff] }
 0x337   : > { %1117 = vmax.xlane.f32.xlu1 %v3368_v42  ;;  %v1038_v43 = vpop.f32.mrf.mxu1  ;;  %2331 = vmatprep.subr.mxu1 %v1900_v39 }
 0x338   : > { %v3374_v45 = vsel %vm583_vm1, %v1038_v43, -1e+30  ;;  %2332 = vmatpush3.msra.mxu1 %v1900_v39 }
 0x339   : > { %1115 = vmax.xlane.f32.xlu0 %v3374_v45  ;;  %v2293_v47 = vpop.f32.mrf.mxu1  ;;  %2333 = vmatprep.subr.mxu1 %v1899_v44 }
 0x33a   : > { %v3380_v49 = vsel %vm583_vm1, %v2293_v47, -1e+30  ;;  %2334 = vmatpush3.msra.mxu1 %v1899_v44 }
 0x33b   : > { %1121 = vmax.xlane.f32.xlu1 %v3380_v49  ;;  %v1048_v50 = vpop.f32.mrf.mxu1 }
 0x33c   : > { %v3386_v52 = vsel %vm583_vm1, %v1048_v50, -1e+30 }
 0x33d   : > { %1119 = vmax.xlane.f32.xlu0 %v3386_v52  ;;  %v2296_v54 = vpop.f32.mrf.mxu1 }
 0x33e   : > { %v3392_v3 = vsel %vm583_vm1, %v2296_v54, -1e+30 }
 0x33f   : > { %1125 = vmax.xlane.f32.xlu1 %v3392_v3  ;;  %v1058_v4 = vpop.f32.mrf.mxu1 }
 0x340   : > { %v3398_v8 = vsel %vm583_vm1, %v1058_v4, -1e+30 }
 0x341   : > { %1123 = vmax.xlane.f32.xlu0 %v3398_v8  ;;  %v2299_v11 = vpop.f32.mrf.mxu1 }
 0x342   : > { %v3404_v29 = vsel %vm583_vm1, %v2299_v11, -1e+30 }
 0x343   : > { %1129 = vmax.xlane.f32.xlu1 %v3404_v29  ;;  %v1068_v31 = vpop.f32.mrf.mxu1 }
 0x344   : > { %v3410_v35 = vsel %vm583_vm1, %v1068_v31, -1e+30 }
 0x345   : > { %1127 = vmax.xlane.f32.xlu0 %v3410_v35  ;;  %v2302_v37 = vpop.f32.mrf.mxu1 }
 0x346   : > { %v3416_v41 = vsel %vm583_vm1, %v2302_v37, -1e+30 }
 0x347   : > { %1133 = vmax.xlane.f32.xlu1 %v3416_v41  ;;  %v1078_v43 = vpop.f32.mrf.mxu1 }
 0x348   : > { %v3422_v47 = vsel %vm583_vm1, %v1078_v43, -1e+30 }
 0x349   : > { %1131 = vmax.xlane.f32.xlu0 %v3422_v47 }
 0x34b   : > { %680 = vadd.xlane.f32.xlu1 %v3211_v46 }
 0x34f   : > { %682 = vadd.xlane.f32.xlu1 %v3216_v53 }
 0x353   : > { %684 = vadd.xlane.f32.xlu1 %v3219_v55 }
 0x357   : > { %686 = vadd.xlane.f32.xlu1 %v3225_v62 }
 0x35b   : > { %688 = vadd.xlane.f32.xlu1 %v3228_v0 }
 0x35f   : > { %690 = vadd.xlane.f32.xlu1 %v3234_v7 }
 0x363   : > { %692 = vadd.xlane.f32.xlu1 %v3237_v9 }
 0x367   : > { %694 = vadd.xlane.f32.xlu1 %v3242_v14 }
 0x36b   : > { %696 = vadd.xlane.f32.xlu1 %v3245_v17 }
 0x36f   : > { %698 = vadd.xlane.f32.xlu1 %v3249_v19 }
 0x373   : > { %700 = vadd.xlane.f32.xlu1 %v3252_v20 }
 0x377   : > { %702 = vadd.xlane.f32.xlu1 %v3256_v21 }
 0x37b   : > { %704 = vadd.xlane.f32.xlu1 %v3259_v23 }
 0x37f   : > { %706 = vadd.xlane.f32.xlu1 %v3263_v24 }
 0x383   : > { %708 = vadd.xlane.f32.xlu1 %v3266_v26 }
 0x387   : > { %710 = vadd.xlane.f32.xlu1 %v3271_v28 }
 0x3b4   : > { %v1106_v40 = vpop.xlane.xlu1 %1105 }
 0x3b5   : > { %v1136_v46 = vsub.f32 %v3337_v27, %v1106_v40 }
 0x3b6   : > { %v1104_v53 = vpop.xlane.xlu0 %1103 }
 0x3b7   : > { %v1135_v55 = vsub.f32 %v3342_v30, %v1104_v53  ;;  %v1153_v62 = vmul.f32 1.442695, %v1136_v46 }
 0x3b8   : > { %v1110_v0 = vpop.xlane.xlu1 %1109 }
 0x3b9   : > { %v1151_v7 = vmul.f32 1.442695, %v1135_v55  ;;  %v1138_v9 = vsub.f32 %v3347_v32, %v1110_v0 }
 0x3ba   : > { %v1108_v14 = vpop.xlane.xlu0 %1107 }
 0x3bb   : > { %2499 = vpow2.f32 %v1151_v7  ;;  %v1137_v17 = vsub.f32 %v3352_v34, %v1108_v14  ;;  %v1157_v19 = vmul.f32 1.442695, %v1138_v9 }
 0x3bc   : > { %2501 = vpow2.f32 %v1153_v62  ;;  %v1114_v20 = vpop.xlane.xlu1 %1113 }
 0x3bd   : > { %v1155_v21 = vmul.f32 1.442695, %v1137_v17  ;;  %v1140_v23 = vsub.f32 %v3357_v36, %v1114_v20 }
 0x3be   : > { %v1112_v24 = vpop.xlane.xlu0 %1111 }
 0x3bf   : > { %2503 = vpow2.f32 %v1155_v21  ;;  %v1139_v26 = vsub.f32 %v3362_v38, %v1112_v24  ;;  %v1161_v28 = vmul.f32 1.442695, %v1140_v23 }
 0x3c0   : > { %2505 = vpow2.f32 %v1157_v19  ;;  %v1118_v27 = vpop.xlane.xlu1 %1117 }
 0x3c1   : > { %v1159_v30 = vmul.f32 1.442695, %v1139_v26  ;;  %v1142_v32 = vsub.f32 %v3368_v42, %v1118_v27  ;;  %v1409_v27 = vld [vmem:[%s3461_s6 + $0x78] sm:$0xff] }
 0x3c2   : > { %v1116_v48 = vpop.xlane.xlu0 %1115 }
 0x3c3   : > { %2507 = vpow2.f32 %v1159_v30  ;;  %v1141_v34 = vsub.f32 %v3374_v45, %v1116_v48  ;;  %v1165_v50 = vmul.f32 1.442695, %v1142_v32  ;;  %v1424_v30 = vld [vmem:[%s3461_s6 + $0xf0] sm:$0xff]  ;;  %v1423_v48 = vld [vmem:[%s3461_s6 + $0xe8] sm:$0xff] }
 0x3c4   : > { %2509 = vpow2.f32 %v1161_v28  ;;  %v1122_v51 = vpop.xlane.xlu1 %1121  ;;  %v1425_v28 = vld [vmem:[%s3461_s6 + $0xf8] sm:$0xff]  ;;  %v1408_v32 = vld [vmem:[%s3461_s6 + $0x70] sm:$0xff] }
 0x3c5   : > { %v1163_v54 = vmul.f32 1.442695, %v1141_v34  ;;  %v1144_v36 = vsub.f32 %v3380_v49, %v1122_v51  ;;  %2055 = vmatprep.subr.mxu0 %v1425_v28  ;;  %v1407_v34 = vld [vmem:[%s3461_s6 + $0x68] sm:$0xff]  ;;  %v1406_v51 = vld [vmem:[%s3461_s6 + $0x60] sm:$0xff] }
 0x3c6   : > { %v1120_v2 = vpop.xlane.xlu0 %1119  ;;  %2056 = vmatpush3.msra.mxu0 %v1409_v27 }
 0x3c7   : > { %2511 = vpow2.f32 %v1163_v54  ;;  %v1143_v38 = vsub.f32 %v3386_v52, %v1120_v2  ;;  %v1169_v6 = vmul.f32 1.442695, %v1144_v36  ;;  %2057 = vmatprep.subr.mxu0 %v1424_v30  ;;  %v1421_v54 = vld [vmem:[%s3461_s6 + $0xd8] sm:$0xff]  ;;  %v1420_v2 = vld [vmem:[%s3461_s6 + $0xd0] sm:$0xff] }
 0x3c8   : > { %v2500_v4 = vpop.eup %2499  ;;  %2513 = vpow2.f32 %v1165_v50  ;;  %v1126_v11 = vpop.xlane.xlu1 %1125  ;;  %2058 = vmatpush3.msra.mxu0 %v1408_v32  ;;  %v1422_v50 = vld [vmem:[%s3461_s6 + $0xe0] sm:$0xff]  ;;  %v1405_v36 = vld [vmem:[%s3461_s6 + $0x58] sm:$0xff] }
 0x3c9   : > { %v2502_v25 = vpop.eup %2501  ;;  %v1167_v42 = vmul.f32 1.442695, %v1143_v38  ;;  %v1146_v31 = vsub.f32 %v3392_v3, %v1126_v11  ;;  %2335 = vmatprep.mubr.f32.mxu1 %v2500_v4  ;;  %1183 = vadd.xlane.f32.xlu0 %v2500_v4  ;;  %v1404_v38 = vld [vmem:[%s3461_s6 + $0x50] sm:$0xff]  ;;  %v1419_v4 = vld [vmem:[%s3461_s6 + $0xc8] sm:$0xff]  ;;  %v1418_v11 = vld [vmem:[%s3461_s6 + $0xc0] sm:$0xff] }
 0x3ca   : > { %2336 = vmatmul.mubr.f32.vlgmr.msra.gmra.mxu1 %v2502_v25  ;;  %v1124_v45 = vpop.xlane.xlu0 %1123  ;;  %2059 = vmatprep.subr.mxu0 %v1423_v48 }
 0x3cb   : > { %2515 = vpow2.f32 %v1167_v42  ;;  %v1145_v33 = vsub.f32 %v3398_v8, %v1124_v45  ;;  %v1173_v37 = vmul.f32 1.442695, %v1146_v31  ;;  %2060 = vmatpush3.msra.mxu0 %v1407_v34  ;;  %v1417_v42 = vld [vmem:[%s3461_s6 + $0xb8] sm:$0xff]  ;;  %v1416_v45 = vld [vmem:[%s3461_s6 + $0xb0] sm:$0xff] }
 0x3cc   : > { %v2504_v49 = vpop.eup %2503  ;;  %2517 = vpow2.f32 %v1169_v6  ;;  %v1130_v39 = vpop.xlane.xlu1 %1129  ;;  %2061 = vmatprep.subr.mxu0 %v1422_v50  ;;  %v1403_v6 = vld [vmem:[%s3461_s6 + $0x48] sm:$0xff]  ;;  %v1401_v31 = vld [vmem:[%s3461_s6 + $0x38] sm:$0xff] }
 0x3cd   : > { %v2506_v52 = vpop.eup %2505  ;;  %v1171_v43 = vmul.f32 1.442695, %v1145_v33  ;;  %v1148_v44 = vsub.f32 %v3404_v29, %v1130_v39  ;;  %2338 = vmatprep.mubr.f32.mxu1 %v2504_v49  ;;  %1185 = vadd.xlane.f32.xlu0 %v2502_v25  ;;  %v1402_v25 = vld [vmem:[%s3461_s6 + $0x40] sm:$0xff]  ;;  %v1400_v33 = vld [vmem:[%s3461_s6 + $0x30] sm:$0xff] }
 0x3ce   : > { %2339 = vmatmul.mubr.f32.gmra.mxu1 %v2506_v52  ;;  %v1128_v40 = vpop.xlane.xlu0 %1127  ;;  %2062 = vmatpush3.msra.mxu0 %v1406_v51  ;;  %v1414_v39 = vld [vmem:[%s3461_s6 + $0xa0] sm:$0xff] }
 0x3cf   : > { %2519 = vpow2.f32 %v1171_v43  ;;  %v1147_v3 = vsub.f32 %v3410_v35, %v1128_v40  ;;  %v1177_v53 = vmul.f32 1.442695, %v1148_v44  ;;  %2063 = vmatprep.subr.mxu0 %v1421_v54  ;;  %v1413_v43 = vld [vmem:[%s3461_s6 + $0x98] sm:$0xff]  ;;  %v1412_v40 = vld [vmem:[%s3461_s6 + $0x90] sm:$0xff] }
 0x3d0   : > { %v2508_v46 = vpop.eup %2507  ;;  %2521 = vpow2.f32 %v1173_v37  ;;  %v1134_v55 = vpop.xlane.xlu1 %1133  ;;  %2064 = vmatpush3.msra.mxu0 %v1405_v36  ;;  %v1399_v37 = vld [vmem:[%s3461_s6 + $0x28] sm:$0xff]  ;;  %v1397_v44 = vld [vmem:[%s3461_s6 + $0x18] sm:$0xff] }
 0x3d1   : > { %v2510_v8 = vpop.eup %2509  ;;  %v1175_v62 = vmul.f32 1.442695, %v1147_v3  ;;  %v1150_v0 = vsub.f32 %v3416_v41, %v1134_v55  ;;  %2341 = vmatprep.mubr.f32.mxu1 %v2508_v46  ;;  %1187 = vadd.xlane.f32.xlu0 %v2504_v49  ;;  %v1415_v49 = vld [vmem:[%s3461_s6 + $0xa8] sm:$0xff]  ;;  %v1396_v3 = vld [vmem:[%s3461_s6 + $0x10] sm:$0xff]  ;;  %v1410_v55 = vld [vmem:[%s3461_s6 + $0x80] sm:$0xff] }
 0x3d2   : > { %2342 = vmatmul.mubr.f32.gmra.mxu1 %v2510_v8  ;;  %v1132_v7 = vpop.xlane.xlu0 %1131  ;;  %2065 = vmatprep.subr.mxu0 %v1420_v2 }
 0x3d3   : > { %2523 = vpow2.f32 %v1175_v62  ;;  %v1149_v29 = vsub.f32 %v3422_v47, %v1132_v7  ;;  %v1181_v14 = vmul.f32 1.442695, %v1150_v0  ;;  %2066 = vmatpush3.msra.mxu0 %v1404_v38 }
 0x3d4   : > { %v2512_v9 = vpop.eup %2511  ;;  %2525 = vpow2.f32 %v1177_v53  ;;  %2067 = vmatprep.subr.mxu0 %v1419_v4  ;;  %v1395_v53 = vld [vmem:[%s3461_s6 + $0x8] sm:$0xff]  ;;  %v681_v0 = vpop.xlane.xlu1 %680 }
 0x3d5   : > { %v2514_v17 = vpop.eup %2513  ;;  %v1179_v35 = vmul.f32 1.442695, %v1149_v29  ;;  %2344 = vmatprep.mubr.f32.mxu1 %v2512_v9  ;;  %1189 = vadd.xlane.f32.xlu0 %v2506_v52  ;;  %v1398_v52 = vld [vmem:[%s3461_s6 + $0x20] sm:$0xff] }
 0x3d6   : > { %2345 = vmatmul.mubr.f32.gmra.mxu1 %v2514_v17  ;;  %2068 = vmatpush3.msra.mxu0 %v1403_v6 }
 0x3d7   : > { %2527 = vpow2.f32 %v1179_v35  ;;  %2069 = vmatprep.subr.mxu0 %v1418_v11 }
 0x3d8   : > { %v2516_v19 = vpop.eup %2515  ;;  %2529 = vpow2.f32 %v1181_v14  ;;  %2070 = vmatpush3.msra.mxu0 %v1402_v25  ;;  %v683_v29 = vpop.xlane.xlu1 %682 }
 0x3d9   : > { %v2518_v20 = vpop.eup %2517  ;;  %2347 = vmatprep.mubr.f32.mxu1 %v2516_v19  ;;  %1191 = vadd.xlane.f32.xlu0 %v2508_v46  ;;  %v1411_v46 = vld [vmem:[%s3461_s6 + $0x88] sm:$0xff]  ;;  %2531 = vrcp.f32 %v681_v0 }
 0x3da   : > { %2348 = vmatmul.mubr.f32.gmra.mxu1 %v2518_v20  ;;  %2071 = vmatprep.subr.mxu0 %v1417_v42 }
 0x3db   : > { %2072 = vmatpush3.msra.mxu0 %v1401_v31 }
 0x3dc   : > { %v2520_v41 = vpop.eup %2519  ;;  %2073 = vmatprep.subr.mxu0 %v1416_v45  ;;  %v685_v14 = vpop.xlane.xlu1 %684 }
 0x3dd   : > { %v2522_v21 = vpop.eup %2521  ;;  %2350 = vmatprep.mubr.f32.mxu1 %v2520_v41  ;;  %1193 = vadd.xlane.f32.xlu0 %v2510_v8  ;;  %v1394_v8 = vld [vmem:[%s3461_s6] sm:$0xff] }
 0x3de   : > { %2351 = vmatmul.mubr.f32.gmra.mxu1 %v2522_v21  ;;  %2074 = vmatpush3.msra.mxu0 %v1400_v33 }
 0x3df   : > { %2075 = vmatprep.subr.mxu0 %v1415_v49 }
 0x3e0   : > { %v2524_v47 = vpop.eup %2523  ;;  %2076 = vmatpush3.msra.mxu0 %v1399_v37  ;;  %v687_v35 = vpop.xlane.xlu1 %686 }
 0x3e1   : > { %v2526_v23 = vpop.eup %2525  ;;  %2353 = vmatprep.mubr.f32.mxu1 %v2524_v47  ;;  %1195 = vadd.xlane.f32.xlu0 %v2512_v9 }
 0x3e2   : > { %2354 = vmatmul.mubr.f32.gmra.mxu1 %v2526_v23  ;;  %2077 = vmatprep.subr.mxu0 %v1414_v39 }
 0x3e3   : > { %2078 = vmatpush3.msra.mxu0 %v1398_v52 }
 0x3e4   : > { %v2528_v24 = vpop.eup %2527  ;;  %2079 = vmatprep.subr.mxu0 %v1413_v43 }
 0x3e5   : > { %v2530_v26 = vpop.eup %2529  ;;  %1197 = vadd.xlane.f32.xlu0 %v2514_v17  ;;  %2356 = vmatprep.mubr.f32.mxu1 %v2528_v24 }
 0x3e6   : > { %2357 = vmatmul.mubr.f32.gmra.mxu1 %v2530_v26  ;;  %2080 = vmatpush3.msra.mxu0 %v1397_v44  ;;  %v2532_v27 = vpop.eup %2531 }
 0x3e7   : > { %2081 = vmatprep.subr.mxu0 %v1412_v40  ;;  %v873_v36 = vmul.f32 %v2532_v27, %v3299_v57 }
 0x3e8   : > { %2082 = vmatpush3.msra.mxu0 %v1396_v3 }
 0x3e9   : > { %1199 = vadd.xlane.f32.xlu0 %v2516_v19  ;;  %2083 = vmatprep.subr.mxu0 %v1411_v46 }
 0x3ea   : > { %2084 = vmatpush3.msra.mxu0 %v1395_v53 }
 0x3eb   : > { %2085 = vmatprep.subr.mxu0 %v1410_v55 }
 0x3ec   : > { %2086 = vmatpush3.msra.mxu0 %v1394_v8 }
 0x3ed   : > { %1201 = vadd.xlane.f32.xlu0 %v2518_v20  ;;  %v689_v20 = vpop.xlane.xlu1 %688 }
 0x3f1   : > { %1203 = vadd.xlane.f32.xlu0 %v2520_v41 }
 0x3f5   : > { %1205 = vadd.xlane.f32.xlu0 %v2522_v21  ;;  %v691_v21 = vpop.xlane.xlu1 %690 }
 0x3f9   : > { %1207 = vadd.xlane.f32.xlu0 %v2524_v47 }
 0x3fd   : > { %1209 = vadd.xlane.f32.xlu0 %v2526_v23  ;;  %v693_v23 = vpop.xlane.xlu1 %692 }
 0x401   : > { %1211 = vadd.xlane.f32.xlu0 %v2528_v24 }
 0x405   : > { %1213 = vadd.xlane.f32.xlu0 %v2530_v26  ;;  %v695_v26 = vpop.xlane.xlu1 %694 }
 0x409   : > { %v697_v34 = vpop.xlane.xlu1 %696 }
 0x40d   : > { %v699_v31 = vpop.xlane.xlu1 %698 }
 0x411   : > { %v701_v44 = vpop.xlane.xlu1 %700 }
 0x415   : > { %v703_v0 = vpop.xlane.xlu1 %702 }
 0x452   : > { %v1184_v62 = vpop.xlane.xlu0 %1183 }
 0x453   : > { %2533 = vrcp.f32 %v1184_v62 }
 0x456   : > { %v1186_v7 = vpop.xlane.xlu0 %1185 }
 0x457   : > { %2535 = vrcp.f32 %v1186_v7 }
 0x458   : > { %2537 = vrcp.f32 %v683_v29 }
 0x45a   : > { %v1188_v9 = vpop.xlane.xlu0 %1187 }
 0x45b   : > { %2539 = vrcp.f32 %v1188_v9 }
 0x45c   : > { %2541 = vrcp.f32 %v685_v14 }
 0x45e   : > { %v1190_v17 = vpop.xlane.xlu0 %1189 }
 0x45f   : > { %2543 = vrcp.f32 %v1190_v17 }
 0x460   : > { %2545 = vrcp.f32 %v687_v35  ;;  %v2534_v30 = vpop.eup %2533 }
 0x462   : > { %v1192_v19 = vpop.xlane.xlu0 %1191 }
 0x463   : > { %2547 = vrcp.f32 %v1192_v19 }
 0x464   : > { %v2536_v51 = vpop.eup %2535  ;;  %2549 = vrcp.f32 %v689_v20  ;;  %v705_v20 = vpop.xlane.xlu1 %704 }
 0x465   : > { %v2538_v2 = vpop.eup %2537 }
 0x466   : > { %v1194_v41 = vpop.xlane.xlu0 %1193  ;;  %v874_v25 = vmul.f32 %v2538_v2, %v3297_v56 }
 0x467   : > { %2551 = vrcp.f32 %v1194_v41 }
 0x468   : > { %v2540_v6 = vpop.eup %2539  ;;  %2553 = vrcp.f32 %v691_v21  ;;  %v707_v27 = vpop.xlane.xlu1 %706 }
 0x469   : > { %v2542_v42 = vpop.eup %2541 }
 0x46a   : > { %v1196_v47 = vpop.xlane.xlu0 %1195  ;;  %v875_v49 = vmul.f32 %v2542_v42, %v3303_v59 }
 0x46b   : > { %2555 = vrcp.f32 %v1196_v47 }
 0x46c   : > { %v2544_v57 = vpop.eup %2543  ;;  %2557 = vrcp.f32 %v693_v23 }
 0x46d   : > { %v2546_v37 = vpop.eup %2545 }
 0x46e   : > { %v1198_v24 = vpop.xlane.xlu0 %1197  ;;  %v876_v40 = vmul.f32 %v2546_v37, %v3301_v58 }
 0x46f   : > { %2559 = vrcp.f32 %v1198_v24 }
 0x470   : > { %v2548_v56 = vpop.eup %2547  ;;  %2561 = vrcp.f32 %v695_v26 }
 0x471   : > { %v2550_v3 = vpop.eup %2549 }
 0x472   : > { %v1200_v32 = vpop.xlane.xlu0 %1199  ;;  %v877_v8 = vmul.f32 %v2550_v3, %v3307_v61 }
 0x473   : > { %2563 = vrcp.f32 %v1200_v32 }
 0x474   : > { %v2552_v55 = vpop.eup %2551  ;;  %2565 = vrcp.f32 %v697_v34 }
 0x475   : > { %v2554_v62 = vpop.eup %2553 }
 0x476   : > { %v1202_v11 = vpop.xlane.xlu0 %1201  ;;  %v878_v58 = vmul.f32 %v2554_v62, %v3305_v60 }
 0x477   : > { %2567 = vrcp.f32 %v1202_v11 }
 0x478   : > { %v2556_v9 = vpop.eup %2555  ;;  %2569 = vrcp.f32 %v699_v31 }
 0x479   : > { %v2558_v14 = vpop.eup %2557 }
 0x47a   : > { %v1204_v52 = vpop.xlane.xlu0 %1203  ;;  %v879_v41 = vmul.f32 %v2558_v14, %v3311_v1 }
 0x47b   : > { %2571 = vrcp.f32 %v1204_v52 }
 0x47c   : > { %v2560_v61 = vpop.eup %2559  ;;  %2573 = vrcp.f32 %v701_v44 }
 0x47d   : > { %v2562_v21 = vpop.eup %2561 }
 0x47e   : > { %v1206_v59 = vpop.xlane.xlu0 %1205  ;;  %v880_v26 = vmul.f32 %v2562_v21, %v3309_v63  ;;  %v1429_v21 = vld [vmem:[#allocation2 + $0x18] sm:$0xff] }
 0x47f   : > { %2575 = vrcp.f32 %v1206_v59 }
 0x480   : > { %v2564_v24 = vpop.eup %2563  ;;  %2577 = vrcp.f32 %v703_v0  ;;  %v1426_v0 = vld [vmem:[#allocation2] sm:$0xff] }
 0x482   : > { %v1208_v35 = vpop.xlane.xlu0 %1207 }
 0x483   : > { %2579 = vrcp.f32 %v1208_v35 }
 0x484   : > { %2581 = vrcp.f32 %v705_v20 }
 0x486   : > { %v1210_v60 = vpop.xlane.xlu0 %1209 }
 0x487   : > { %2583 = vrcp.f32 %v1210_v60 }
 0x488   : > { %2585 = vrcp.f32 %v707_v27 }
 0x48a   : > { %v2337_v28 = vpop.f32.mrf.mxu1 }
 0x48b   : > { %v1377_v38 = vmul.f32 %v2536_v51, %v2337_v28  ;;  %v2566_v28 = vpop.eup %2565  ;;  %v1212_v51 = vpop.xlane.xlu0 %1211 }
 0x48c   : > { %v1281_v48 = vpop.f32.mrf.mxu1  ;;  %v881_v1 = vmul.f32 %v2566_v28, %v3320_v10  ;;  %2587 = vrcp.f32 %v1212_v51 }
 0x48d   : > { %v1376_v50 = vmul.f32 %v2534_v30, %v1281_v48  ;;  %v2568_v48 = vpop.eup %2567 }
 0x48e   : > { %v2340_v54 = vpop.f32.mrf.mxu1  ;;  %v2570_v34 = vpop.eup %2569 }
 0x48f   : > { %1506 = vmatprep.mubr.f32.mxu0 %v1376_v50  ;;  %v1379_v39 = vmul.f32 %v2544_v57, %v2340_v54  ;;  %v2572_v63 = vpop.eup %2571  ;;  %v882_v2 = vmul.f32 %v2570_v34, %v3316_v5  ;;  %v1214_v10 = vpop.xlane.xlu0 %1213 }
 0x490   : > { %v1291_v4 = vpop.f32.mrf.mxu1  ;;  %1507 = vmatmul.mubr.f32.vlgmr.msra.gmra.mxu0 %v873_v36  ;;  %v709_v36 = vpop.xlane.xlu1 %708 }
 0x491   : > { %1511 = vmatprep.mubr.f32.mxu0 %v1377_v38  ;;  %v1378_v45 = vmul.f32 %v2540_v6, %v1291_v4  ;;  %v2574_v38 = vpop.eup %2573  ;;  %2589 = vrcp.f32 %v709_v36 }
 0x492   : > { %v2343_v33 = vpop.f32.mrf.mxu1  ;;  %v2576_v11 = vpop.eup %2575  ;;  %2591 = vrcp.f32 %v1214_v10 }
 0x493   : > { %v1381_v7 = vmul.f32 %v2552_v55, %v2343_v33  ;;  %v2578_v42 = vpop.eup %2577 }
 0x494   : > { %1512 = vmatmul.mubr.f32.gmra.mxu0 %v874_v25  ;;  %v1301_v43 = vpop.f32.mrf.mxu1  ;;  %v883_v25 = vmul.f32 %v2574_v38, %v3325_v12  ;;  %v711_v31 = vpop.xlane.xlu1 %710  ;;  %v884_v5 = vmul.f32 %v2578_v42, %v3323_v13  ;;  %v1434_v42 = vld [vmem:[#allocation2 + $0x40] sm:$0xff] }
 0x495   : > { %1516 = vmatprep.mubr.f32.mxu0 %v1378_v45  ;;  %v1380_v46 = vmul.f32 %v2548_v56, %v1301_v43  ;;  %v2580_v57 = vpop.eup %2579  ;;  %2593 = vrcp.f32 %v711_v31 }
 0x496   : > { %v2346_v53 = vpop.f32.mrf.mxu1 }
 0x497   : > { %v1383_v47 = vmul.f32 %v2560_v61, %v2346_v53 }
 0x498   : > { %1517 = vmatmul.mubr.f32.gmra.mxu0 %v875_v49  ;;  %v1311_v29 = vpop.f32.mrf.mxu1  ;;  %v2582_v49 = vpop.eup %2581 }
 0x499   : > { %1521 = vmatprep.mubr.f32.mxu0 %v1379_v39  ;;  %v1382_v17 = vmul.f32 %v2556_v9, %v1311_v29  ;;  %v2584_v52 = vpop.eup %2583  ;;  %v885_v43 = vmul.f32 %v2582_v49, %v3329_v18 }
 0x49a   : > { %v2349_v19 = vpop.f32.mrf.mxu1  ;;  %v2586_v12 = vpop.eup %2585 }
 0x49b   : > { %v1385_v50 = vmul.f32 %v2568_v48, %v2349_v19  ;;  %v886_v3 = vmul.f32 %v2586_v12, %v3327_v15  ;;  %v1428_v19 = vld [vmem:[#allocation2 + $0x10] sm:$0xff]  ;;  %v1431_v48 = vld [vmem:[#allocation2 + $0x28] sm:$0xff] }
 0x49c   : > { %1522 = vmatmul.mubr.f32.gmra.mxu0 %v876_v40  ;;  %v1321_v23 = vpop.f32.mrf.mxu1  ;;  %v2588_v40 = vpop.eup %2587 }
 0x49d   : > { %1526 = vmatprep.mubr.f32.mxu0 %v1380_v46  ;;  %v1384_v30 = vmul.f32 %v2564_v24, %v1321_v23 }
 0x49e   : > { %v2352_v32 = vpop.f32.mrf.mxu1  ;;  %v2590_v46 = vpop.eup %2589 }
 0x49f   : > { %v1387_v45 = vmul.f32 %v2576_v11, %v2352_v32  ;;  %v2592_v13 = vpop.eup %2591  ;;  %v887_v55 = vmul.f32 %v2590_v46, %v3333_v22 }
 0x4a0   : > { %1527 = vmatmul.mubr.f32.gmra.mxu0 %v877_v8  ;;  %v1331_v54 = vpop.f32.mrf.mxu1 }
 0x4a1   : > { %1531 = vmatprep.mubr.f32.mxu0 %v1381_v7  ;;  %v1386_v4 = vmul.f32 %v2572_v63, %v1331_v54  ;;  %v1432_v54 = vld [vmem:[#allocation2 + $0x30] sm:$0xff] }
 0x4a2   : > { %v2355_v6 = vpop.f32.mrf.mxu1  ;;  %v2594_v59 = vpop.eup %2593 }
 0x4a3   : > { %v1389_v44 = vmul.f32 %v2584_v52, %v2355_v6  ;;  %v888_v18 = vmul.f32 %v2594_v59, %v3331_v16  ;;  %v1438_v59 = vld [vmem:[#allocation2 + $0x60] sm:$0xff] }
 0x4a4   : > { %1532 = vmatmul.mubr.f32.gmra.mxu0 %v878_v58  ;;  %v1341_v33 = vpop.f32.mrf.mxu1  ;;  %v1427_v58 = vld [vmem:[#allocation2 + $0x8] sm:$0xff] }
 0x4a5   : > { %1536 = vmatprep.mubr.f32.mxu0 %v1382_v17  ;;  %v1388_v37 = vmul.f32 %v2580_v57, %v1341_v33 }
 0x4a6   : > { %v2358_v39 = vpop.f32.mrf.mxu1 }
 0x4a7   : > { %v1391_v8 = vmul.f32 %v2592_v13, %v2358_v39 }
 0x4a8   : > { %1537 = vmatmul.mubr.f32.gmra.mxu0 %v879_v41  ;;  %v1351_v56 = vpop.f32.mrf.mxu1 }
 0x4a9   : > { %1541 = vmatprep.mubr.f32.mxu0 %v1383_v47  ;;  %v1390_v53 = vmul.f32 %v2588_v40, %v1351_v56 }
 0x4ac   : > { %1542 = vmatmul.mubr.f32.gmra.mxu0 %v880_v26  ;;  %v1430_v26 = vld [vmem:[#allocation2 + $0x20] sm:$0xff] }
 0x4ad   : > { %1546 = vmatprep.mubr.f32.mxu0 %v1384_v30 }
 0x4b0   : > { %1547 = vmatmul.mubr.f32.gmra.mxu0 %v881_v1 }
 0x4b1   : > { %1551 = vmatprep.mubr.f32.mxu0 %v1385_v50 }
 0x4b4   : > { %1552 = vmatmul.mubr.f32.gmra.mxu0 %v882_v2 }
 0x4b5   : > { %1556 = vmatprep.mubr.f32.mxu0 %v1386_v4  ;;  %v1433_v4 = vld [vmem:[#allocation2 + $0x38] sm:$0xff] }
 0x4b8   : > { %1557 = vmatmul.mubr.f32.gmra.mxu0 %v883_v25 }
 0x4b9   : > { %1561 = vmatprep.mubr.f32.mxu0 %v1387_v45 }
 0x4bc   : > { %1562 = vmatmul.mubr.f32.gmra.mxu0 %v884_v5  ;;  %v1435_v5 = vld [vmem:[#allocation2 + $0x48] sm:$0xff] }
 0x4bd   : > { %1566 = vmatprep.mubr.f32.mxu0 %v1388_v37 }
 0x4c0   : > { %1567 = vmatmul.mubr.f32.gmra.mxu0 %v885_v43  ;;  %v1436_v43 = vld [vmem:[#allocation2 + $0x50] sm:$0xff] }
 0x4c1   : > { %1571 = vmatprep.mubr.f32.mxu0 %v1389_v44 }
 0x4c4   : > { %1572 = vmatmul.mubr.f32.gmra.mxu0 %v886_v3  ;;  %v1437_v3 = vld [vmem:[#allocation2 + $0x58] sm:$0xff] }
 0x4c5   : > { %1576 = vmatprep.mubr.f32.mxu0 %v1390_v53 }
 0x4c8   : > { %1577 = vmatmul.mubr.f32.gmra.mxu0 %v887_v55 }
 0x4c9   : > { %1581 = vmatprep.mubr.f32.mxu0 %v1391_v8 }
 0x4cc   : > { %1582 = vmatmul.mubr.f32.gmra.mxu0 %v888_v18 }
 0x550   : > { %v2087_v62 = vpop.f32.mrf.mxu0 }
 0x552   : > { %v2088_v7 = vpop.f32.mrf.mxu0 }
 0x553   : > { %v2089_v29 = vadd.f32 %v2088_v7, %v2087_v62  ;;  %v1439_v7 = vld [vmem:[#allocation2 + $0x68] sm:$0xff] }
 0x554   : > { %v2090_v15 = vpop.f32.mrf.mxu0 }
 0x555   : > { %v1587_v9 = vadd.f32 %v2089_v29, %v1426_v0 }
 0x556   : > { %v2091_v14 = vpop.f32.mrf.mxu0 }
 0x557   : > { %1604 = vst.msk [vmem:[#allocation2] sm:$0xff] %vm1603_vm2, %v1587_v9  ;;  %v2092_v17 = vadd.f32 %v2091_v14, %v2090_v15  ;;  %v1440_v14 = vld [vmem:[#allocation2 + $0x70] sm:$0xff] }
 0x558   : > { %v2093_v22 = vpop.f32.mrf.mxu0 }
 0x559   : > { %v1588_v35 = vadd.f32 %v2092_v17, %v1427_v58 }
 0x55a   : > { %v2094_v20 = vpop.f32.mrf.mxu0 }
 0x55b   : > { %1605 = vst.msk [vmem:[#allocation2 + $0x8] sm:$0xff] %vm1603_vm2, %v1588_v35  ;;  %v2095_v16 = vadd.f32 %v2094_v20, %v2093_v22  ;;  %v1441_v20 = vld [vmem:[#allocation2 + $0x78] sm:$0xff] }
 0x55c   : > { %v2096_v61 = vpop.f32.mrf.mxu0 }
 0x55d   : > { %v1589_v41 = vadd.f32 %v2095_v16, %v1428_v19 }
 0x55e   : > { %v2097_v47 = vpop.f32.mrf.mxu0 }
 0x55f   : > { %1606 = vst.msk [vmem:[#allocation2 + $0x10] sm:$0xff] %vm1603_vm2, %v1589_v41  ;;  %v2098_v23 = vadd.f32 %v2097_v47, %v2096_v61 }
 0x560   : > { %v2099_v24 = vpop.f32.mrf.mxu0 }
 0x561   : > { %v1590_v60 = vadd.f32 %v2098_v23, %v1429_v21 }
 0x562   : > { %v2100_v28 = vpop.f32.mrf.mxu0 }
 0x563   : > { %1607 = vst.msk [vmem:[#allocation2 + $0x18] sm:$0xff] %vm1603_vm2, %v1590_v60  ;;  %v2101_v27 = vadd.f32 %v2100_v28, %v2099_v24 }
 0x564   : > { %v2102_v30 = vpop.f32.mrf.mxu0 }
 0x565   : > { %v1591_v32 = vadd.f32 %v2101_v27, %v1430_v26 }
 0x566   : > { %v2103_v1 = vpop.f32.mrf.mxu0 }
 0x567   : > { %1608 = vst.msk [vmem:[#allocation2 + $0x20] sm:$0xff] %vm1603_vm2, %v1591_v32  ;;  %v2104_v34 = vadd.f32 %v2103_v1, %v2102_v30 }
 0x568   : > { %v2105_v50 = vpop.f32.mrf.mxu0 }
 0x569   : > { %v1592_v51 = vadd.f32 %v2104_v34, %v1431_v48 }
 0x56a   : > { %v2106_v36 = vpop.f32.mrf.mxu0 }
 0x56b   : > { %1609 = vst.msk [vmem:[#allocation2 + $0x28] sm:$0xff] %vm1603_vm2, %v1592_v51  ;;  %v2107_v63 = vadd.f32 %v2106_v36, %v2105_v50 }
 0x56c   : > { %v2108_v2 = vpop.f32.mrf.mxu0 }
 0x56d   : > { %v1593_v38 = vadd.f32 %v2107_v63, %v1432_v54 }
 0x56e   : > { %v2109_v6 = vpop.f32.mrf.mxu0 }
 0x56f   : > { %1610 = vst.msk [vmem:[#allocation2 + $0x30] sm:$0xff] %vm1603_vm2, %v1593_v38  ;;  %v2110_v11 = vadd.f32 %v2109_v6, %v2108_v2 }
 0x570   : > { %v2111_v10 = vpop.f32.mrf.mxu0 }
 0x571   : > { %v1594_v25 = vadd.f32 %v2110_v11, %v1433_v4 }
 0x572   : > { %v2112_v31 = vpop.f32.mrf.mxu0 }
 0x573   : > { %1611 = vst.msk [vmem:[#allocation2 + $0x38] sm:$0xff] %vm1603_vm2, %v1594_v25  ;;  %v2113_v45 = vadd.f32 %v2112_v31, %v2111_v10 }
 0x574   : > { %v2114_v33 = vpop.f32.mrf.mxu0 }
 0x575   : > { %v1595_v57 = vadd.f32 %v2113_v45, %v1434_v42 }
 0x576   : > { %v2115_v49 = vpop.f32.mrf.mxu0 }
 0x577   : > { %1612 = vst.msk [vmem:[#allocation2 + $0x40] sm:$0xff] %vm1603_vm2, %v1595_v57  ;;  %v2116_v37 = vadd.f32 %v2115_v49, %v2114_v33 }
 0x578   : > { %v2117_v39 = vpop.f32.mrf.mxu0 }
 0x579   : > { %v1596_v52 = vadd.f32 %v2116_v37, %v1435_v5 }
 0x57a   : > { %v2118_v12 = vpop.f32.mrf.mxu0 }
 0x57b   : > { %1613 = vst.msk [vmem:[#allocation2 + $0x48] sm:$0xff] %vm1603_vm2, %v1596_v52  ;;  %v2119_v44 = vadd.f32 %v2118_v12, %v2117_v39 }
 0x57c   : > { %v2120_v56 = vpop.f32.mrf.mxu0 }
 0x57d   : > { %v1597_v40 = vadd.f32 %v2119_v44, %v1436_v43 }
 0x57e   : > { %v2121_v46 = vpop.f32.mrf.mxu0 }
 0x57f   : > { %1614 = vst.msk [vmem:[#allocation2 + $0x50] sm:$0xff] %vm1603_vm2, %v1597_v40  ;;  %v2122_v53 = vadd.f32 %v2121_v46, %v2120_v56 }
 0x580   : > { %v2123_v13 = vpop.f32.mrf.mxu0 }
 0x581   : > { %v1598_v55 = vadd.f32 %v2122_v53, %v1437_v3 }
 0x582   : > { %v2124_v8 = vpop.f32.mrf.mxu0 }
 0x583   : > { %1615 = vst.msk [vmem:[#allocation2 + $0x58] sm:$0xff] %vm1603_vm2, %v1598_v55  ;;  %v2125_v18 = vadd.f32 %v2124_v8, %v2123_v13 }
 0x584   : > { %v2126_v62 = vpop.f32.mrf.mxu0 }
 0x585   : > { %v1599_v0 = vadd.f32 %v2125_v18, %v1438_v59 }
 0x586   : > { %v2127_v29 = vpop.f32.mrf.mxu0 }
 0x587   : > { %1616 = vst.msk [vmem:[#allocation2 + $0x60] sm:$0xff] %vm1603_vm2, %v1599_v0  ;;  %v2128_v15 = vadd.f32 %v2127_v29, %v2126_v62 }
 0x588   : > { %v2129_v9 = vpop.f32.mrf.mxu0 }
 0x589   : > { %v1600_v58 = vadd.f32 %v2128_v15, %v1439_v7 }
 0x58a   : > { %v2130_v17 = vpop.f32.mrf.mxu0 }
 0x58b   : > { %1617 = vst.msk [vmem:[#allocation2 + $0x68] sm:$0xff] %vm1603_vm2, %v1600_v58  ;;  %v2131_v22 = vadd.f32 %v2130_v17, %v2129_v9 }
 0x58c   : > { %v2132_v35 = vpop.f32.mrf.mxu0 }
 0x58d   : > { %v1601_v19 = vadd.f32 %v2131_v22, %v1440_v14 }
 0x58e   : > { %v2133_v16 = vpop.f32.mrf.mxu0 }
 0x58f   : > { %1618 = vst.msk [vmem:[#allocation2 + $0x70] sm:$0xff] %vm1603_vm2, %v1601_v19  ;;  %v2134_v61 = vadd.f32 %v2133_v16, %v2132_v35  ;;  %1623 = sbr.rel (%p1916_p1) target bundleno = 1440 (0x5a0), region = 60 }
 0x591   : > { %v1602_v41 = vadd.f32 %v2134_v61, %v1441_v20 }
 0x593   : > { %1619 = vst.msk [vmem:[#allocation2 + $0x78] sm:$0xff] %vm1603_vm2, %v1602_v41 }
 0x594   : > { %v1624_v21 = vld [vmem:[#allocation2] sm:$0xff]  ;;  %v1625_v23 = vld [vmem:[#allocation2 + $0x8] sm:$0xff]  ;;  %v1626_v26 = vld [vmem:[#allocation2 + $0x10] sm:$0xff] }
 0x595   : > { %v1917_v47 = vld [vmem:[%s3649_s11] ss:$0 sm:$0xff]  ;;  %v1627_v28 = vld [vmem:[#allocation2 + $0x18] sm:$0xff]  ;;  %v1629_v1 = vld [vmem:[#allocation2 + $0x28] sm:$0xff] }
 0x596   : > { %v1647_v24 = vadd.f32 %v1917_v47, %v1624_v21  ;;  %v1648_v60 = vadd.f32 %v1917_v47, %v1625_v23  ;;  %v1628_v27 = vld [vmem:[#allocation2 + $0x20] sm:$0xff]  ;;  %v1649_v30 = vadd.f32 %v1917_v47, %v1626_v26  ;;  %v1650_v32 = vadd.f32 %v1917_v47, %v1627_v28  ;;  %v1630_v34 = vld [vmem:[#allocation2 + $0x30] sm:$0xff]  ;;  %v1631_v50 = vld [vmem:[#allocation2 + $0x38] sm:$0xff] }
 0x597   : > { %v1651_v48 = vadd.f32 %v1917_v47, %v1628_v27  ;;  %v1652_v51 = vadd.f32 %v1917_v47, %v1629_v1  ;;  %v1653_v54 = vadd.f32 %v1917_v47, %v1630_v34  ;;  %v1654_v36 = vadd.f32 %v1917_v47, %v1631_v50  ;;  %v1632_v63 = vld [vmem:[#allocation2 + $0x40] sm:$0xff]  ;;  %v1633_v2 = vld [vmem:[#allocation2 + $0x48] sm:$0xff]  ;;  %v1634_v38 = vld [vmem:[#allocation2 + $0x50] sm:$0xff] }
 0x598   : > { %1663 = vst.msk [vmem:[%s3037_s13] sm:$0xff] %vm1603_vm2, %v1647_v24  ;;  %1664 = vst.msk [vmem:[%s3037_s13 + $0x8] sm:$0xff] %vm1603_vm2, %v1648_v60  ;;  %v1655_v4 = vadd.f32 %v1917_v47, %v1632_v63  ;;  %v1656_v6 = vadd.f32 %v1917_v47, %v1633_v2  ;;  %v1657_v11 = vadd.f32 %v1917_v47, %v1634_v38  ;;  %v1635_v10 = vld [vmem:[#allocation2 + $0x58] sm:$0xff]  ;;  %v1636_v25 = vld [vmem:[#allocation2 + $0x60] sm:$0xff] }
 0x599   : > { %1665 = vst.msk [vmem:[%s3037_s13 + $0x10] sm:$0xff] %vm1603_vm2, %v1649_v30  ;;  %1666 = vst.msk [vmem:[%s3037_s13 + $0x18] sm:$0xff] %vm1603_vm2, %v1650_v32  ;;  %v1637_v42 = vld [vmem:[#allocation2 + $0x68] sm:$0xff]  ;;  %v1658_v31 = vadd.f32 %v1917_v47, %v1635_v10  ;;  %v1659_v45 = vadd.f32 %v1917_v47, %v1636_v25  ;;  %v1638_v57 = vld [vmem:[#allocation2 + $0x70] sm:$0xff] }
 0x59a   : > { %1667 = vst.msk [vmem:[%s3037_s13 + $0x20] sm:$0xff] %vm1603_vm2, %v1651_v48  ;;  %1668 = vst.msk [vmem:[%s3037_s13 + $0x28] sm:$0xff] %vm1603_vm2, %v1652_v51  ;;  %v1660_v33 = vadd.f32 %v1917_v47, %v1637_v42  ;;  %v1639_v5 = vld [vmem:[#allocation2 + $0x78] sm:$0xff]  ;;  %v1661_v49 = vadd.f32 %v1917_v47, %v1638_v57 }
 0x59b   : > { %1669 = vst.msk [vmem:[%s3037_s13 + $0x30] sm:$0xff] %vm1603_vm2, %v1653_v54  ;;  %1670 = vst.msk [vmem:[%s3037_s13 + $0x38] sm:$0xff] %vm1603_vm2, %v1654_v36  ;;  %v1662_v37 = vadd.f32 %v1917_v47, %v1639_v5 }
 0x59c   : > { %1671 = vst.msk [vmem:[%s3037_s13 + $0x40] sm:$0xff] %vm1603_vm2, %v1655_v4  ;;  %1672 = vst.msk [vmem:[%s3037_s13 + $0x48] sm:$0xff] %vm1603_vm2, %v1656_v6 }
 0x59d   : > { %1673 = vst.msk [vmem:[%s3037_s13 + $0x50] sm:$0xff] %vm1603_vm2, %v1657_v11  ;;  %1674 = vst.msk [vmem:[%s3037_s13 + $0x58] sm:$0xff] %vm1603_vm2, %v1658_v31 }
 0x59e   : > { %1675 = vst.msk [vmem:[%s3037_s13 + $0x60] sm:$0xff] %vm1603_vm2, %v1659_v45  ;;  %1676 = vst.msk [vmem:[%s3037_s13 + $0x68] sm:$0xff] %vm1603_vm2, %v1660_v33 }
 0x59f   : > { %1677 = vst.msk [vmem:[%s3037_s13 + $0x70] sm:$0xff] %vm1603_vm2, %v1661_v49  ;;  %1678 = vst.msk [vmem:[%s3037_s13 + $0x78] sm:$0xff] %vm1603_vm2, %v1662_v37 }
 0x5a0 PF: > { %s21_s28 = sadd.s32 1, %s2773_s28   ;;  %s3650_s24 = sld [smem:[#allocation12_spill]] }
 0x5a1   : > { %p18_p0 = scmp.ge.s32.totalorder %s21_s28, 6   ;;  %s3651_s26 = sld [smem:[#allocation14_spill]] }
 0x5a2   : > { %s3652_s12 = sld [smem:[#allocation15_spill]]  ;;  %s3653_s18 = smov %s2737_s19 }
 0x5a3   : > { %s3654_s19 = smov %s2741_s20  ;;  %s3655_s20 = smov %s2965_s4 }
 0x5a4   : > { %s3656_s21 = smov %s2749_s22  ;;  %s3657_s22 = smov %s2753_s23 }
 0x5a5   : > { %s3658_s23 = smov %s2968_s3  ;;  %s3659_s25 = smov %s2769_s27 }
 0x5a6   :  { %20 = sbr.rel (!%p18_p0) target bundleno = 15 (0xf), region = 118 }
 0x5a8   : > { %s3660_s27 = smov %s3652_s12 }
 0x5ab   :  { %1709 = vsyncpa [#allocation4], 1 }
 0x5ac   :  { %1711 = vsyncpa [#allocation4 + $0x1], 1 }
 0x5ad   :  { %1712 = vsyncpa [#allocation6], 1 }
 0x5ae   :  { %1714 = vsyncpa [#allocation6 + $0x1], 1 }

</bundles_post_ra>
